<compile_context>
chip_gen: v7x
topology: tpu7x:2x2x1
jax: 0.10.0
libtpu: 0.0.40
codegen_flags: <defaults>
</compile_context>

<pallas_src>
import jax
import jax.numpy as jnp
from jax import lax
from jax.experimental import pallas as pl
from jax.experimental.pallas import tpu as pltpu


# ---------------------------------------------------------------------------
# Hardware-aware sizing helpers
# ---------------------------------------------------------------------------

def _vmem_budget_bytes():
    """Generation-aware scoped-VMEM budget: ~3/4 of physical VMEM, capped at
    100 MiB (v5e/v6e: 128 MiB phys -> ~96 MiB; v7x: 64 MiB phys -> 48 MiB)."""
    try:
        cap = int(pltpu.get_tpu_info().vmem_capacity_bytes)
    except Exception:
        cap = 64 * 1024 * 1024  # conservative fallback
    return min((cap * 3) // 4, 100 * 1024 * 1024)


def _pick_tile(n, candidates=(512, 256, 128)):
    """Largest candidate tile dividing n (multiples of 256 preferred for the
    v6e/v7x 256x256 MXU); fall back to a single full-size block."""
    for c in candidates:
        if n % c == 0:
            return c
    return n


def _choose_attn_tiles(nq, nk, dq, h, dout, out_itemsize, budget, single_buf_w):
    tq = _pick_tile(nq)
    tk = _pick_tile(nk)

    def est(tq_, tk_):
        b = 0
        b += 2 * (tq_ * dq * 2)                       # x tile (bf16, dbl-buf)
        b += 2 * 2 * (tk_ * dout * 2)                 # K + V chunks
        b += (1 if single_buf_w else 2) * (h * dq * 2)  # Wq
        b += 2 * (tq_ * dout * out_itemsize)          # output tile
        b += tq_ * h * 2 + tq_ * dout * 4 + 2 * tq_ * 128 * 4  # scratches
        b += 3 * (tq_ * tk_ * 4)                      # live f32 score/prob
        return b

    # Shrink the kv chunk first, then the q tile, keeping >= 128.
    while est(tq, tk) > budget:
        if tk > 128 and tk % 256 == 0:
            tk //= 2
        elif tq > 128 and tq % 256 == 0:
            tq //= 2
        else:
            break
    return tq, tk


# ---------------------------------------------------------------------------
# Kernel 1: K/V projection prologue (K = y Wk^T, V = K Wv^T), tiled over Nk
# ---------------------------------------------------------------------------

def _kv_proj_kernel(y_ref, wk_ref, wv_ref, k_ref, v_ref):
    y = y_ref[0]                                                  # (tk, Din) bf16
    # K = y @ Wk^T: contract on Wk's in_features dim -> no transpose / XLU.
    k = lax.dot_general(y, wk_ref[...],
                        dimension_numbers=(((1,), (1,)), ((), ())),
                        preferred_element_type=jnp.float32)        # (tk, Dout)
    kb = k.astype(jnp.bfloat16)
    # V = value(key(y)) -- matches the reassignment in the PyTorch forward.
    v = lax.dot_general(kb, wv_ref[...],
                        dimension_numbers=(((1,), (1,)), ((), ())),
                        preferred_element_type=jnp.float32)        # (tk, Dout)
    k_ref[0] = kb
    v_ref[0] = v.astype(jnp.bfloat16)


def _project_kv(y, wk, wv, *, tk, single_buffer_weights, vmem_limit):
    B, Nk, Din = y.shape
    Dout = wk.shape[0]
    w_mode = pl.Buffered(1) if single_buffer_weights else None

    flops = 2 * B * Nk * Din * Dout + 2 * B * Nk * Dout * Dout
    bytes_accessed = int(y.size * y.dtype.itemsize
                         + (wk.size + wv.size) * 2
                         + 2 * B * Nk * Dout * 2)

    return pl.pallas_call(
        _kv_proj_kernel,
        out_shape=(jax.ShapeDtypeStruct((B, Nk, Dout), jnp.bfloat16),
                   jax.ShapeDtypeStruct((B, Nk, Dout), jnp.bfloat16)),
        grid_spec=pltpu.PrefetchScalarGridSpec(
            num_scalar_prefetch=0,
            grid=(B, Nk // tk),
            in_specs=[
                pl.BlockSpec((1, tk, Din), lambda b, i: (b, i, 0)),   # y chunk
                pl.BlockSpec((Dout, Din), lambda b, i: (0, 0),
                             pipeline_mode=w_mode),                   # Wk
                pl.BlockSpec((Dout, Din), lambda b, i: (0, 0),
                             pipeline_mode=w_mode),                   # Wv
            ],
            out_specs=[
                pl.BlockSpec((1, tk, Dout), lambda b, i: (b, i, 0)),  # K
                pl.BlockSpec((1, tk, Dout), lambda b, i: (b, i, 0)),  # V
            ],
        ),
        compiler_params=pltpu.CompilerParams(
            dimension_semantics=("parallel", "parallel"),
            vmem_limit_bytes=vmem_limit,
        ),
        cost_estimate=pl.CostEstimate(flops=flops, transcendentals=0,
                                      bytes_accessed=bytes_accessed),
    )(y, wk, wv)


# ---------------------------------------------------------------------------
# Kernel 2: flash-style attention (online softmax over Nk chunks)
# ---------------------------------------------------------------------------

def _flash_attn_kernel(x_ref, wq_ref, k_ref, v_ref, o_ref,
                       q_sc, m_sc, l_sc, acc_sc):
    ki = pl.program_id(2)

    @pl.when(ki == 0)
    def _():
        # Q projection for this q tile (1/sqrt(out_dim) pre-folded into Wq),
        # cached in bf16 VMEM scratch and reused for every kv step.
        q = lax.dot_general(x_ref[0], wq_ref[...],
                            dimension_numbers=(((1,), (1,)), ((), ())),
                            preferred_element_type=jnp.float32)     # (tq, H)
        q_sc[...] = q.astype(jnp.bfloat16)
        m_sc[...] = jnp.full_like(m_sc, -jnp.inf)
        l_sc[...] = jnp.zeros_like(l_sc)
        acc_sc[...] = jnp.zeros_like(acc_sc)

    # Scores for this (tq, tk) chunk: contract last dims directly ("trans_b"
    # form -> MXU-native, no materialized k.T).
    s = lax.dot_general(q_sc[...], k_ref[0],
                        dimension_numbers=(((1,), (1,)), ((), ())),
                        preferred_element_type=jnp.float32)          # (tq, tk)

    # Online (flash) softmax update.
    m_prev = m_sc[...]
    m_new = jnp.maximum(m_prev, jnp.max(s, axis=-1, keepdims=True))
    alpha = jnp.exp(m_prev - m_new)
    p = jnp.exp(s - m_new)
    l_sc[...] = alpha * l_sc[...] + jnp.sum(p, axis=-1, keepdims=True)
    acc_sc[...] = alpha * acc_sc[...] + jnp.dot(
        p.astype(jnp.bfloat16), v_ref[0], preferred_element_type=jnp.float32)
    m_sc[...] = m_new

    @pl.when(ki == pl.num_programs(2) - 1)
    def _():
        o = acc_sc[...] * pl.reciprocal(l_sc[...], approx=True)
        o_ref[0] = o.astype(o_ref.dtype)


def _flash_attention(x, k, v, wq, *, tq, tk, out_dtype, single_buffer_weights,
                     vmem_limit):
    B, Nq, Dq = x.shape
    _, Nk, Dout = k.shape
    H = wq.shape[0]
    w_mode = pl.Buffered(1) if single_buffer_weights else None

    flops = 2 * B * (Nq * Dq * H + Nq * Nk * H + Nq * Nk * Dout)
    transcendentals = B * Nq * Nk
    bytes_accessed = int(x.size * x.dtype.itemsize + k.size * 2 + v.size * 2
                         + wq.size * 2
                         + B * Nq * Dout * jnp.dtype(out_dtype).itemsize)

    return pl.pallas_call(
        _flash_attn_kernel,
        out_shape=jax.ShapeDtypeStruct((B, Nq, Dout), out_dtype),
        grid_spec=pltpu.PrefetchScalarGridSpec(
            num_scalar_prefetch=0,
            grid=(B, Nq // tq, Nk // tk),
            in_specs=[
                pl.BlockSpec((1, tq, Dq), lambda b, i, j: (b, i, 0)),    # x tile
                pl.BlockSpec((H, Dq), lambda b, i, j: (0, 0),
                             pipeline_mode=w_mode),                       # Wq
                pl.BlockSpec((1, tk, Dout), lambda b, i, j: (b, j, 0)),  # K chunk
                pl.BlockSpec((1, tk, Dout), lambda b, i, j: (b, j, 0)),  # V chunk
            ],
            out_specs=pl.BlockSpec((1, tq, Dout), lambda b, i, j: (b, i, 0)),
            scratch_shapes=[
                pltpu.VMEM((tq, H), jnp.bfloat16),     # cached (scaled) Q
                pltpu.VMEM((tq, 1), jnp.float32),      # running max
                pltpu.VMEM((tq, 1), jnp.float32),      # running denom
                pltpu.VMEM((tq, Dout), jnp.float32),   # output accumulator
            ],
        ),
        compiler_params=pltpu.CompilerParams(
            # K/V are precomputed, so the q-tile axis has no cross-step
            # dependency -> parallel (uses both TensorCores on v7x).
            dimension_semantics=("parallel", "parallel", "arbitrary"),
            vmem_limit_bytes=vmem_limit,
        ),
        cost_estimate=pl.CostEstimate(flops=flops,
                                      transcendentals=transcendentals,
                                      bytes_accessed=bytes_accessed),
    )(x, wq, k, v)


# ---------------------------------------------------------------------------
# Public wrapper
# ---------------------------------------------------------------------------

def cross_attention(x, y, wq, wk, wv, out_dim, *, tq=None, tk=None,
                    out_dtype=None, single_buffer_weights=True):
    """x: (B, Nq, in_q_dim), y: (B, Nk, in_dim).
    Weights in PyTorch layout: wq (hid_q_dim, in_q_dim), wk (out_dim, in_dim),
    wv (out_dim, in_dim).  All Linear layers are bias=False."""
    B, Nq, Dq = x.shape
    By, Nk, Din = y.shape
    H = wq.shape[0]
    Dout = wk.shape[0]

    assert By == B
    assert wq.shape == (H, Dq)
    assert wk.shape == (Dout, Din)
    # The PyTorch forward applies value() to key(y), so the module is only
    # well-defined when in_dim == out_dim.
    assert wv.shape == (Dout, Din) and Din == Dout, (
        "CrossAttention.forward applies value() to key(y); needs in_dim == out_dim")
    assert H == Dout, "score matmul requires hid_q_dim == out_dim"
    assert Dout == out_dim

    if out_dtype is None:
        out_dtype = x.dtype

    # One-time parameter preparation (in a real model this happens at init):
    # bf16 weights for the MXU (f32 accumulation in-kernel) with the
    # 1/sqrt(out_dim) softmax scale folded into Wq.
    scale = 1.0 / (out_dim ** 0.5)
    wq = (wq.astype(jnp.float32) * scale).astype(jnp.bfloat16)
    wk = wk.astype(jnp.bfloat16)
    wv = wv.astype(jnp.bfloat16)

    # bf16 activations across the pallas_call boundary: halves the biggest
    # HBM->VMEM DMAs (y / K / V) and the x block.
    x = x.astype(jnp.bfloat16)
    y = y.astype(jnp.bfloat16)

    vmem_limit = _vmem_budget_bytes()
    out_itemsize = jnp.dtype(out_dtype).itemsize
    auto_tq, auto_tk = _choose_attn_tiles(Nq, Nk, Dq, H, Dout, out_itemsize,
                                          vmem_limit, single_buffer_weights)
    if tq is None:
        tq = auto_tq
    if tk is None:
        tk = auto_tk
    assert Nq % tq == 0 and Nk % tk == 0

    def run(single_buf):
        k, v = _project_kv(y, wk, wv, tk=tk,
                           single_buffer_weights=single_buf,
                           vmem_limit=vmem_limit)
        return _flash_attention(x, k, v, wq, tq=tq, tk=tk,
                                out_dtype=out_dtype,
                                single_buffer_weights=single_buf,
                                vmem_limit=vmem_limit)

    if not single_buffer_weights:
        return run(False)
    try:
        # Block so that any lowering/runtime rejection of pl.Buffered(1)
        # surfaces here and we can fall back to default double-buffering
        # (constant index_map -> the weight is still only DMA'd once).
        return jax.block_until_ready(run(True))
    except Exception:
        return run(False)


def cross_attention_ref(x, y, wq, wk, wv, out_dim):
    q = jnp.einsum("bnd,hd->bnh", x, wq)
    k = jnp.einsum("bmd,od->bmo", y, wk)
    v = jnp.einsum("bmo,po->bmp", k, wv)     # value(key(y)), matching PyTorch
    s = jnp.einsum("bnh,bmh->bnm", q, k) / (out_dim ** 0.5)
    p = jax.nn.softmax(s, axis=-1)
    return jnp.einsum("bnm,bmo->bno", p, v)


if __name__ == "__main__":
    # Small shapes consistent with the module (in_dim == out_dim == hid_q_dim,
    # in_q_dim = in_dim // 2), 256-aligned for the v6e/v7x 256x256 MXU, with
    # Nq and Nk large enough to exercise both the multi-q-tile path and the
    # flash (multi-kv-chunk) online-softmax path: tq = tk = 128 -> 2 q tiles
    # x 2 kv steps per batch element.
    B = 2
    in_dim = 256      # original: 1024
    out_dim = 256     # original: 1024
    in_q_dim = 128    # original: 512
    hid_q_dim = 256   # original: 1024
    Nq = 256          # number of queries (x.shape[1])
    Nk = 256          # number of keys    (y.shape[1])

    key = jax.random.PRNGKey(0)
    kx, ky, kq, kk, kv = jax.random.split(key, 5)

    x = jax.random.normal(kx, (B, Nq, in_q_dim), dtype=jnp.float32)
    y = jax.random.normal(ky, (B, Nk, in_dim), dtype=jnp.float32)

    # PyTorch Linear weight layout: (out_features, in_features); ~1/sqrt(fan_in).
    wq = jax.random.normal(kq, (hid_q_dim, in_q_dim), jnp.float32) / (in_q_dim ** 0.5)
    wk = jax.random.normal(kk, (out_dim, in_dim), jnp.float32) / (in_dim ** 0.5)
    wv = jax.random.normal(kv, (out_dim, in_dim), jnp.float32) / (in_dim ** 0.5)

    out = cross_attention(x, y, wq, wk, wv, out_dim, tq=128, tk=128)
    out = jax.block_until_ready(out)

    ref = cross_attention_ref(x, y, wq, wk, wv, out_dim)
    assert out.shape == (B, Nq, out_dim)
    rel_err = jnp.max(jnp.abs(out - ref)) / (jnp.max(jnp.abs(ref)) + 1e-6)
    assert float(rel_err) < 5e-2, f"relative error too large: {float(rel_err)}"

    print("KERNEL_OK")
</pallas_src>

<mosaic_0001>
module attributes {stable_mosaic.version = 11 : i64} {
  func.func @_kv_proj_kernel(%arg0: i32, %arg1: i32, %arg2: memref<1x128x256xbf16, #tpu.memory_space<vmem>>, %arg3: memref<256x256xbf16, #tpu.memory_space<vmem>>, %arg4: memref<256x256xbf16, #tpu.memory_space<vmem>>, %arg5: memref<1x128x256xbf16, #tpu.memory_space<vmem>>, %arg6: memref<1x128x256xbf16, #tpu.memory_space<vmem>>) attributes {dimension_semantics = [#tpu.dimension_semantics<parallel>, #tpu.dimension_semantics<parallel>], iteration_bounds = array<i64: 2, 2>, scalar_prefetch = 0 : i64, scratch_operands = 0 : i64, tpu.core_type = #tpu.core_type<tc>, window_params = [{transform_indices = @transform_0, window_bounds = array<i64: 1, 128, 256>}, {pipeline_mode = #tpu.pipeline_mode<synchronous>, transform_indices = @transform_1, window_bounds = array<i64: 256, 256>}, {pipeline_mode = #tpu.pipeline_mode<synchronous>, transform_indices = @transform_2, window_bounds = array<i64: 256, 256>}, {transform_indices = @transform_3, window_bounds = array<i64: 1, 128, 256>}, {transform_indices = @transform_4, window_bounds = array<i64: 1, 128, 256>}]} {
    %c0 = arith.constant 0 : index
    %c0_0 = arith.constant 0 : index
    %c0_1 = arith.constant 0 : index
    %0 = vector.load %arg2[%c0, %c0_0, %c0_1] : memref<1x128x256xbf16, #tpu.memory_space<vmem>>, vector<1x128x256xbf16>
    %1 = vector.shape_cast %0 : vector<1x128x256xbf16> to vector<128x256xbf16>
    %c0_2 = arith.constant 0 : index
    %c0_3 = arith.constant 0 : index
    %2 = vector.load %arg3[%c0_2, %c0_3] : memref<256x256xbf16, #tpu.memory_space<vmem>>, vector<256x256xbf16>
    %cst = arith.constant dense<0.000000e+00> : vector<128x256xf32>
    %3 = tpu.matmul %1, %2, %cst {dimension_numbers = #tpu.dot_dimension_numbers<[1], [1], [0], [0], [0, 0, 1, 0], [], []>} : vector<128x256xbf16>, vector<256x256xbf16>, vector<128x256xf32> -> vector<128x256xf32>
    %4 = arith.truncf %3 : vector<128x256xf32> to vector<128x256xbf16>
    %c0_4 = arith.constant 0 : index
    %c0_5 = arith.constant 0 : index
    %5 = vector.load %arg4[%c0_4, %c0_5] : memref<256x256xbf16, #tpu.memory_space<vmem>>, vector<256x256xbf16>
    %cst_6 = arith.constant dense<0.000000e+00> : vector<128x256xf32>
    %6 = tpu.matmul %4, %5, %cst_6 {dimension_numbers = #tpu.dot_dimension_numbers<[1], [1], [0], [0], [0, 0, 1, 0], [], []>} : vector<128x256xbf16>, vector<256x256xbf16>, vector<128x256xf32> -> vector<128x256xf32>
    %c0_7 = arith.constant 0 : index
    %c0_8 = arith.constant 0 : index
    %c0_9 = arith.constant 0 : index
    %7 = vector.load %arg5[%c0_7, %c0_8, %c0_9] : memref<1x128x256xbf16, #tpu.memory_space<vmem>>, vector<1x128x256xbf16>
    %8 = vector.shape_cast %7 : vector<1x128x256xbf16> to vector<128x256xbf16>
    %9 = vector.shape_cast %4 : vector<128x256xbf16> to vector<1x128x256xbf16>
    tpu.vector_store %arg5[%c0_7, %c0_8, %c0_9], %9 {strides = array<i32>} : memref<1x128x256xbf16, #tpu.memory_space<vmem>>, vector<1x128x256xbf16>,
    %10 = arith.truncf %6 : vector<128x256xf32> to vector<128x256xbf16>
    %c0_10 = arith.constant 0 : index
    %c0_11 = arith.constant 0 : index
    %c0_12 = arith.constant 0 : index
    %11 = vector.load %arg6[%c0_10, %c0_11, %c0_12] : memref<1x128x256xbf16, #tpu.memory_space<vmem>>, vector<1x128x256xbf16>
    %12 = vector.shape_cast %11 : vector<1x128x256xbf16> to vector<128x256xbf16>
    %13 = vector.shape_cast %10 : vector<128x256xbf16> to vector<1x128x256xbf16>
    tpu.vector_store %arg6[%c0_10, %c0_11, %c0_12], %13 {strides = array<i32>} : memref<1x128x256xbf16, #tpu.memory_space<vmem>>, vector<1x128x256xbf16>,
    return
  }
  func.func @transform_0(%arg0: i32, %arg1: i32) -> (i32, i32, i32) {
    %c0_i32 = arith.constant 0 : i32
    %c0_i32_0 = arith.constant 0 : i32
    return %arg0, %arg1, %c0_i32 : i32, i32, i32
  }
  func.func @transform_1(%arg0: i32, %arg1: i32) -> (i32, i32) {
    %c0_i32 = arith.constant 0 : i32
    %c0_i32_0 = arith.constant 0 : i32
    %c0_i32_1 = arith.constant 0 : i32
    return %c0_i32, %c0_i32_0 : i32, i32
  }
  func.func @transform_2(%arg0: i32, %arg1: i32) -> (i32, i32) {
    %c0_i32 = arith.constant 0 : i32
    %c0_i32_0 = arith.constant 0 : i32
    %c0_i32_1 = arith.constant 0 : i32
    return %c0_i32, %c0_i32_0 : i32, i32
  }
  func.func @transform_3(%arg0: i32, %arg1: i32) -> (i32, i32, i32) {
    %c0_i32 = arith.constant 0 : i32
    %c0_i32_0 = arith.constant 0 : i32
    return %arg0, %arg1, %c0_i32 : i32, i32, i32
  }
  func.func @transform_4(%arg0: i32, %arg1: i32) -> (i32, i32, i32) {
    %c0_i32 = arith.constant 0 : i32
    %c0_i32_0 = arith.constant 0 : i32
    return %arg0, %arg1, %c0_i32 : i32, i32, i32
  }
}

module attributes {stable_mosaic.version = 11 : i64} {
  func.func @_kv_proj_kernel(%arg0: i32, %arg1: i32, %arg2: memref<1x128x256xbf16, #tpu.memory_space<vmem>>, %arg3: memref<256x256xbf16, #tpu.memory_space<vmem>>, %arg4: memref<256x256xbf16, #tpu.memory_space<vmem>>, %arg5: memref<1x128x256xbf16, #tpu.memory_space<vmem>>, %arg6: memref<1x128x256xbf16, #tpu.memory_space<vmem>>) attributes {dimension_semantics = [#tpu.dimension_semantics<parallel>, #tpu.dimension_semantics<parallel>], iteration_bounds = array<i64: 2, 2>, scalar_prefetch = 0 : i64, scratch_operands = 0 : i64, tpu.core_type = #tpu.core_type<tc>, window_params = [{transform_indices = @transform_0, window_bounds = array<i64: 1, 128, 256>}, {pipeline_mode = #tpu.pipeline_mode<synchronous>, transform_indices = @transform_1, window_bounds = array<i64: 256, 256>}, {pipeline_mode = #tpu.pipeline_mode<synchronous>, transform_indices = @transform_2, window_bounds = array<i64: 256, 256>}, {transform_indices = @transform_3, window_bounds = array<i64: 1, 128, 256>}, {transform_indices = @transform_4, window_bounds = array<i64: 1, 128, 256>}]} {
    %c0 = arith.constant 0 : index
    %c0_0 = arith.constant 0 : index
    %c0_1 = arith.constant 0 : index
    %0 = vector.load %arg2[%c0, %c0_0, %c0_1] : memref<1x128x256xbf16, #tpu.memory_space<vmem>>, vector<1x128x256xbf16>
    %1 = vector.shape_cast %0 : vector<1x128x256xbf16> to vector<128x256xbf16>
    %c0_2 = arith.constant 0 : index
    %c0_3 = arith.constant 0 : index
    %2 = vector.load %arg3[%c0_2, %c0_3] : memref<256x256xbf16, #tpu.memory_space<vmem>>, vector<256x256xbf16>
    %cst = arith.constant dense<0.000000e+00> : vector<128x256xf32>
    %3 = tpu.matmul %1, %2, %cst {dimension_numbers = #tpu.dot_dimension_numbers<[1], [1], [0], [0], [0, 0, 1, 0], [], []>} : vector<128x256xbf16>, vector<256x256xbf16>, vector<128x256xf32> -> vector<128x256xf32>
    %4 = arith.truncf %3 : vector<128x256xf32> to vector<128x256xbf16>
    %c0_4 = arith.constant 0 : index
    %c0_5 = arith.constant 0 : index
    %5 = vector.load %arg4[%c0_4, %c0_5] : memref<256x256xbf16, #tpu.memory_space<vmem>>, vector<256x256xbf16>
    %cst_6 = arith.constant dense<0.000000e+00> : vector<128x256xf32>
    %6 = tpu.matmul %4, %5, %cst_6 {dimension_numbers = #tpu.dot_dimension_numbers<[1], [1], [0], [0], [0, 0, 1, 0], [], []>} : vector<128x256xbf16>, vector<256x256xbf16>, vector<128x256xf32> -> vector<128x256xf32>
    %c0_7 = arith.constant 0 : index
    %c0_8 = arith.constant 0 : index
    %c0_9 = arith.constant 0 : index
    %7 = vector.load %arg5[%c0_7, %c0_8, %c0_9] : memref<1x128x256xbf16, #tpu.memory_space<vmem>>, vector<1x128x256xbf16>
    %8 = vector.shape_cast %7 : vector<1x128x256xbf16> to vector<128x256xbf16>
    %9 = vector.shape_cast %4 : vector<128x256xbf16> to vector<1x128x256xbf16>
    tpu.vector_store %arg5[%c0_7, %c0_8, %c0_9], %9 {strides = array<i32>} : memref<1x128x256xbf16, #tpu.memory_space<vmem>>, vector<1x128x256xbf16>,
    %10 = arith.truncf %6 : vector<128x256xf32> to vector<128x256xbf16>
    %c0_10 = arith.constant 0 : index
    %c0_11 = arith.constant 0 : index
    %c0_12 = arith.constant 0 : index
    %11 = vector.load %arg6[%c0_10, %c0_11, %c0_12] : memref<1x128x256xbf16, #tpu.memory_space<vmem>>, vector<1x128x256xbf16>
    %12 = vector.shape_cast %11 : vector<1x128x256xbf16> to vector<128x256xbf16>
    %13 = vector.shape_cast %10 : vector<128x256xbf16> to vector<1x128x256xbf16>
    tpu.vector_store %arg6[%c0_10, %c0_11, %c0_12], %13 {strides = array<i32>} : memref<1x128x256xbf16, #tpu.memory_space<vmem>>, vector<1x128x256xbf16>,
    return
  }
  func.func @transform_0(%arg0: i32, %arg1: i32) -> (i32, i32, i32) {
    %c0_i32 = arith.constant 0 : i32
    %c0_i32_0 = arith.constant 0 : i32
    return %arg0, %arg1, %c0_i32 : i32, i32, i32
  }
  func.func @transform_1(%arg0: i32, %arg1: i32) -> (i32, i32) {
    %c0_i32 = arith.constant 0 : i32
    %c0_i32_0 = arith.constant 0 : i32
    %c0_i32_1 = arith.constant 0 : i32
    return %c0_i32, %c0_i32_0 : i32, i32
  }
  func.func @transform_2(%arg0: i32, %arg1: i32) -> (i32, i32) {
    %c0_i32 = arith.constant 0 : i32
    %c0_i32_0 = arith.constant 0 : i32
    %c0_i32_1 = arith.constant 0 : i32
    return %c0_i32, %c0_i32_0 : i32, i32
  }
  func.func @transform_3(%arg0: i32, %arg1: i32) -> (i32, i32, i32) {
    %c0_i32 = arith.constant 0 : i32
    %c0_i32_0 = arith.constant 0 : i32
    return %arg0, %arg1, %c0_i32 : i32, i32, i32
  }
  func.func @transform_4(%arg0: i32, %arg1: i32) -> (i32, i32, i32) {
    %c0_i32 = arith.constant 0 : i32
    %c0_i32_0 = arith.constant 0 : i32
    return %arg0, %arg1, %c0_i32 : i32, i32, i32
  }
}

</mosaic_0001>

<bundles_post_ra>
// kernel: tpu_custom_call.1
= control target key start
LH: loop header
LB: loop body
LE: loop exit
PB: predicated region body
PF: predicated region fallthrough
CT: control target
= control target key end

     0   :  { %s2445_s0 = inlined_call_operand.hbm [shape: bf16[2,256,256], index: 0, kind: input, shape index: {}]   ;;  %s2446_s1 = inlined_call_operand.hbm [shape: bf16[256,256], index: 1, kind: input, shape index: {}]   ;;  %s2447_s2 = inlined_call_operand.hbm [shape: bf16[256,256], index: 2, kind: input, shape index: {}]   ;;  %s2448_s3 = inlined_call_operand.hbm [shape: bf16[2,256,256], index: 3, kind: output, shape index: {0}]   ;;  %s2449_s4 = inlined_call_operand.hbm [shape: bf16[2,256,256], index: 4, kind: output, shape index: {1}]  }
   0x1   :  { %2460 = sst [smem:[#allocation18_spill]] %s2446_s1 }
   0x2   :  { %2461 = sst [smem:[#allocation19_spill]] %s2447_s2 }
   0x3   :  { %2462 = sst [smem:[#allocation20_spill]] %s2449_s4 }
   0x4   :  { %10 = vsyncpa [#allocation3], 0 }
   0x5   :  { %12 = vsyncpa [#allocation3 + $0x1], 0 }
   0x6   :  { %13 = vsyncpa [#allocation6], 0 }
   0x7   :  { %14 = vsyncpa [#allocation4], 0 }
   0x8   :  { %16 = vsyncpa [#allocation4 + $0x1], 0 }
   0x9   :  { %17 = vsyncpa [#allocation10], 0 }
   0xa   :  { %19 = vsyncpa [#allocation10 + $0x1], 0  ;;  %s2055_s15 = smov 0   ;;  %s2057_s16 = smov 0  }
   0xb   :  { %s2059_s17 = smov 0   ;;  %s2061_s18 = smov 0  }
   0xc   :  { %s2063_s19 = smov 0   ;;  %s2065_s20 = smov 0  }
   0xd   :  { %s2067_s21 = smov 0   ;;  %s2069_s22 = smov 0  }
   0xe LB: > { %2463 = sst [smem:[#allocation15_spill]] %s1991_s15  ;;  %s1395_s23 = sadd.s32 4294967295, %s2019_s22   ;;  %s2019_s22 = sphi %s2069_s22, %s25_s22   ;;  %s2015_s21 = sphi %s2067_s21, %s2494_s21   ;;  %s2011_s20 = sphi %s2065_s20, %s2493_s20   ;;  %s2007_s19 = sphi %s2063_s19, %s2492_s19   ;;  %s2003_s18 = sphi %s2061_s18, %s2491_s18   ;;  %s1999_s17 = sphi %s2059_s17, %s2490_s17   ;;  %s1995_s16 = sphi %s2057_s16, %s2489_s16   ;;  %s1991_s15 = sphi %s2055_s15, %s2488_s15  }
   0xf   : > { %s1396_s24 = sadd.s32 4294967294, %s2019_s22   ;;  %p59_p0 = scmp.ne.s32.totalorder %s1995_s16, %s1991_s15 }
  0x10   : > { %p2099_p1 = scmp.eq.s32.totalorder %s1395_s23, 0  ;;  %p2103_p2 = scmp.eq.s32.totalorder %s1395_s23, 3 }
  0x11   : > { %p133_p3 = scmp.eq.s32.totalorder %s1396_s24, 3  ;;  %p1397_p5 = scmp.ge.s32.totalorder %s2019_s22, 1 }
  0x12   : > { %s2464_s25 = scalar_select %p2099_p1, 1, 0 }
  0x13   : > { %s2465_s26 = scalar_select %p2103_p2, 1, 0 }
  0x14   : > { %p2109_p4 = por %p2099_p1, %p59_p0  ;;  %p2114_p6 = por %p133_p3, %p59_p0 }
  0x15   : > { %p168_p7 = scmp.lt.s32.totalorder %s2019_s22, 5  ;;  %s2021_s30 = smov [#allocation5]  }
  0x16   : > { %s2466_s27 = scalar_select %p2109_p4, 1, 0 }
  0x17   : > { %s2467_s28 = scalar_select %p2114_p6, 1, 0 }
  0x18   : > { %p2119_p8 = pnand %p1397_p5, %p168_p7  ;;  %s180_s5 = sshll.u32 %s2021_s30, 4  ;;  %s181_s5 = int_to_ptr.vmem [resolvable:$true] %s180_s5 }
  0x19   : > { %2468 = sst [smem:[#allocation16_spill]] %s2467_s28  ;;  %s2022_s7 = smov [#allocation7]  }
  0x1a   : > { %s2469_s29 = scalar_select %p2119_p8, 1, 0 }
  0x1b   : > { %p1585_p9 = pneg %p2119_p8  ;;  %s193_s8 = sshll.u32 %s2022_s7, 4  ;;  %s2131_s8 = int_to_ptr.vmem [resolvable:$true] %s193_s8 }
  0x1c   : > { %s2471_s1 = sld [smem:[#allocation18_spill]] }
  0x1d   : > { %p2127_p10 = pnand %p1585_p9, %p2099_p1 }
  0x1f   : > { %p1801_p12 = pneg %p2127_p10 }
  0x22   : > { %s1799_s11 = scalar_lea.hbm %s2471_s1, 4096 }
  0x23   : > { %p1800_p11 = scmp.ne.s32.totalorder %s2471_s1, %s1799_s11  ;;  %p1806_p3 = scmp.lt.u32.totalorder %s1799_s11, %s2471_s1 }
  0x25   : > { %p1802_p13 = pnand %p1801_p12, %p1800_p11 }
  0x27   : > { %p1803_p0 = pneg %p1802_p13 }
  0x29   : > { %p1808_p5 = pnand %p1806_p3, %p1803_p0 }
  0x2b   : > { %1811 = shalt.err (!%p1808_p5)
}
  0x2c   : > { %s1812_s24 = scalar_lea.vmem %s181_s5, 4096  ;;  %p1820_p1 = scmp.lt.s32.totalorder %s181_s5, %s181_s5 }
  0x2d   : > { %p1813_p7 = scmp.ne.s32.totalorder %s181_s5, %s1812_s24  ;;  %p1821_p4 = scmp.lt.s32.totalorder %s1812_s24, %s1812_s24 }
  0x2f   : > { %p1815_p9 = pnand %p1813_p7, %p1801_p12  ;;  %p1822_p8 = por %p1821_p4, %p1820_p1 }
  0x31   : > { %p1816_p6 = pneg %p1815_p9 }
  0x33   : > { %p1823_p2 = pnand %p1822_p8, %p1816_p6 }
  0x35   : > { %1826 = shalt.err (!%p1823_p2)
}
  0x36   : > { %s2455_s30 = smov 128   ;;  %s2456_s7 = smov 8  }
  0x37   : > { %1588 = dma.hbm_to_vmem [thread:$0]  (!%p2127_p10), %s2471_s1, 4096, %s181_s5, [#allocation6], %s2455_s30, %s2455_s30, %s2456_s7  }
  0x38   : > { %s2472_s2 = sld [smem:[#allocation19_spill]] }
  0x3e   : > { %s1827_s13 = scalar_lea.hbm %s2472_s2, 4096 }
  0x3f   : > { %p1828_p1 = scmp.ne.s32.totalorder %s2472_s2, %s1827_s13  ;;  %p1834_p6 = scmp.lt.u32.totalorder %s1827_s13, %s2472_s2 }
  0x41   : > { %p1830_p2 = pnand %p1828_p1, %p1801_p12 }
  0x43   : > { %p1831_p4 = pneg %p1830_p2 }
  0x45   : > { %p1836_p8 = pnand %p1834_p6, %p1831_p4 }
  0x47   : > { %1839 = shalt.err (!%p1836_p8)
}
  0x48   : > { %s1840_s5 = scalar_lea.vmem %s2131_s8, 4096  ;;  %p1848_p3 = scmp.lt.s32.totalorder %s2131_s8, %s2131_s8 }
  0x49   : > { %p1841_p11 = scmp.ne.s32.totalorder %s2131_s8, %s1840_s5  ;;  %p1849_p5 = scmp.lt.s32.totalorder %s1840_s5, %s1840_s5 }
  0x4b   : > { %p1843_p13 = pnand %p1841_p11, %p1801_p12  ;;  %p1850_p7 = por %p1849_p5, %p1848_p3 }
  0x4d   : > { %p1844_p0 = pneg %p1843_p13 }
  0x4f   : > { %p1851_p9 = pnand %p1850_p7, %p1844_p0 }
  0x51   : > { %1854 = shalt.err (!%p1851_p9)
}
  0x52   : > { %1591 = dma.hbm_to_vmem [thread:$0]  (!%p2127_p10), %s2472_s2, 4096, %s2131_s8, [#allocation6], %s2455_s30, %s2455_s30, %s2456_s7  }
  0x53   : > { %s34_s6 = sadd.s32 1, %s2011_s20  ;;  %s37_s10 = sadd.s32 1, %s2015_s21 }
  0x54   : > { %p35_p12 = scmp.ge.s32.totalorder %s34_s6, 2  ;;  %s46_s11 = sadd.s32 1, %s1999_s17 }
  0x55   : > { %p53_p1 = scmp.ne.s32.totalorder %s1999_s17, %s1995_s16  ;;  %p54_p2 = scmp.eq.s32.totalorder %s2019_s22, 0 }
  0x56   : > { %s2496_s6 = smov (%p35_p12, %s34_s6), 0  ;;  %s2498_s10 = smov (!%p35_p12, %s37_s10), %s2015_s21 }
  0x57   : > { %2473 = sst [smem:[#allocation17_spill]] %s2496_s6  ;;  %s42_s12 = ssub.s32 %s2011_s20, %s2496_s6 }
  0x58   : > { %p2197_p4 = por %p54_p2, %p53_p1  ;;  %p39_p10 = scmp.ge.s32.totalorder %s2498_s10, 2 }
  0x59   : > { %p2475_p6 = scmp.ne.s32.totalorder %s2465_s26, 0  ;;  %p1605_p11 = scmp.lt.s32.totalorder %s2019_s22, 4 }
  0x5a   : > { %s207_s14 = sand.u32 1, %s1999_s17   ;;  %s2500_s10 = smov (%p39_p10, %s2498_s10), 0 }
  0x5b   : > { %p2203_p8 = por %p2475_p6, %p53_p1  ;;  %s1401_s23 = sshll.u32 %s207_s14, 7 }
  0x5c   : > { %s41_s24 = ssub.s32 %s2015_s21, %s2500_s10  ;;  %s1536_s28 = sshll.u32 %s2011_s20, 5 }
  0x5d   : > { %s43_s5 = sor.u32 %s42_s12, %s41_s24  ;;  %s1404_s9 = sshll.u32 %s2015_s21, 6 }
  0x5e   : > { %p44_p13 = scmp.eq.s32.totalorder %s43_s5, 0  ;;  %s218_s30 = sadd.s32 %s1536_s28, %s1404_s9 }
  0x5f   : > { %s211_s7 = scalar_lea.vmem [#allocation2], %s1401_s23  ;;  %s1405_s2 = sshll.u32 %s218_s30, 6 }
  0x60   : > { %s221_s26 = sshll.u32 %s211_s7, 4  ;;  %s2223_s4 = scalar_lea.hbm %s2445_s0, %s1405_s2  ;;  %s2218_s26 = int_to_ptr.vmem [resolvable:$true] %s221_s26 }
  0x61   : > { %s2216_s1 = scalar_select %p44_p13, %s1999_s17, %s46_s11  }
  0x62   : > { %p2229_p0 = pnand %p1605_p11, %p2197_p4  ;;  %s2233_s30 = scalar_lea.sflag [#allocation3], %s207_s14 }
  0x63   : > { %s1855_s7 = scalar_lea.hbm %s2223_s4, 2048  ;;  %s1860_s6 = scalar_lea.hbm %s2445_s0, 8192 }
  0x64   : > { %p1856_p3 = scmp.ne.s32.totalorder %s2223_s4, %s1855_s7  ;;  %p1857_p5 = pneg %p2229_p0 }
  0x65   : > { %p1861_p12 = scmp.lt.u32.totalorder %s2223_s4, %s2445_s0  ;;  %p1862_p1 = scmp.lt.u32.totalorder %s1860_s6, %s1855_s7 }
  0x66   : > { %p1858_p7 = pnand %p1857_p5, %p1856_p3  ;;  %p1864_p4 = scmp.lt.u32.totalorder %s1855_s7, %s2223_s4 }
  0x67   : > { %p1863_p2 = por %p1862_p1, %p1861_p12 }
  0x68   : > { %p1859_p9 = pneg %p1858_p7 }
  0x69   : > { %p1865_p10 = por %p1864_p4, %p1863_p2 }
  0x6b   : > { %p1866_p6 = pnand %p1865_p10, %p1859_p9 }
  0x6d   : > { %1869 = shalt.err (!%p1866_p6)
}
  0x6e   : > { %s1870_s14 = scalar_lea.vmem %s2218_s26, 2048  ;;  %s2025_s23 = smov [#allocation2]  }
  0x6f   : > { %p1871_p11 = scmp.ne.s32.totalorder %s2218_s26, %s1870_s14  ;;  %s1875_s24 = sshll.u32 %s2025_s23, 4  ;;  %s1876_s24 = int_to_ptr.vmem [resolvable:$false] %s1875_s24 }
  0x70   : > { %s1877_s5 = scalar_lea.vmem %s1876_s24, 4096  ;;  %p1878_p7 = scmp.lt.s32.totalorder %s2218_s26, %s1876_s24 }
  0x71   : > { %p1873_p13 = pnand %p1871_p11, %p1857_p5  ;;  %p1879_p12 = scmp.lt.s32.totalorder %s1877_s5, %s1870_s14 }
  0x73   : > { %p1874_p3 = pneg %p1873_p13  ;;  %p1880_p1 = por %p1879_p12, %p1878_p7 }
  0x75   : > { %p1881_p2 = pnand %p1880_p1, %p1874_p3 }
  0x77   : > { %1884 = shalt.err (!%p1881_p2)
}
  0x78   : > { %s2478_s28 = smov 8   ;;  %s2479_s9 = smov 128  }
  0x79   : > { %1595 = dma.hbm_to_vmem [thread:$0]  (!%p2229_p0), %s2223_s4, 2048, %s2218_s26, %s2233_s30, %s2479_s9, %s2479_s9, %s2478_s28  }
  0x7a   : > { %p2480_p5 = scmp.ne.s32.totalorder %s2469_s29, 0 }
  0x7b   : > { %s2267_s7 = sand.u32 (!%p2480_p5), 1, %s1995_s16   ;;  %p2481_p9 = scmp.ne.s32.totalorder (!%p2480_p5), %s2466_s27, 0 }
  0x7c   : > { %233 = sbr.rel (%p2480_p5) target bundleno = 769 (0x301), region = 32  ;;  %s2270_s2 = sshll.u32 (!%p2480_p5), %s2267_s7, 7 }
  0x7d   : > { %s236_s12 = scalar_lea.sflag (!%p2480_p5), [#allocation3], %s2267_s7  ;;  %s2274_s15 = scalar_lea.vmem (!%p2480_p5), [#allocation2], %s2270_s2 }
  0x83   : > { %1974 = dma.done.wait (%p2481_p9), %s236_s12, 2048  }
  0x84   : > { %1976 = vsyncadd (%p2481_p9), %s236_s12, 4294965248  ;;  %p2482_p0 = scmp.ne.s32.totalorder %s2464_s25, 0 }
  0x86   : > { %1978 = dma.done.wait (%p2482_p0), [#allocation6], 8192  }
  0x87   : > { %1980 = vsyncadd (%p2482_p0), [#allocation6], 4294959104  ;;  %v1679_v0 = vld [vmem:[#allocation5 + $0x4] ss:$8 sps:$4 sm:$0xff]   ;;  %v1681_v1 = vld [vmem:[#allocation5] ss:$8 sps:$4 sm:$0xff]  }
  0x88   : > { %568 = vmatprep.subr.bf16.mxu0 %v1679_v0  ;;  %v1682_v2 = vld [vmem:[#allocation5 + $0x14] ss:$8 sps:$4 sm:$0xff]   ;;  %v1684_v3 = vld [vmem:[#allocation5 + $0x10] ss:$8 sps:$4 sm:$0xff]   ;;  %v1685_v4 = vld [vmem:[#allocation5 + $0x24] ss:$8 sps:$4 sm:$0xff]  }
  0x89   : > { %569 = vmatpush1.bf16.xpose.msra.mxu0 %v1681_v1  ;;  %v1687_v5 = vld [vmem:[#allocation5 + $0x20] ss:$8 sps:$4 sm:$0xff]   ;;  %v1688_v6 = vld [vmem:[#allocation5 + $0x34] ss:$8 sps:$4 sm:$0xff]   ;;  %v1729_v7 = vld [vmem:[%s2274_s15 + $0x4] ss:$8 sps:$4 sm:$0xff]  }
  0x8a   : > { %570 = vmatprep.subr.bf16.mxu0 %v1682_v2  ;;  %v1690_v8 = vld [vmem:[#allocation5 + $0x30] ss:$8 sps:$4 sm:$0xff]   ;;  %v1691_v9 = vld [vmem:[#allocation5 + $0x44] ss:$8 sps:$4 sm:$0xff]   ;;  %600 = vmatprep.mubr.bf16.mxu0 %v1729_v7  ;;  %v1693_v10 = vld [vmem:[#allocation5 + $0x40] ss:$8 sps:$4 sm:$0xff]  }
  0x8b   : > { %v1694_v11 = vld [vmem:[#allocation5 + $0x54] ss:$8 sps:$4 sm:$0xff]   ;;  %v1696_v12 = vld [vmem:[#allocation5 + $0x50] ss:$8 sps:$4 sm:$0xff]   ;;  %v1697_v13 = vld [vmem:[#allocation5 + $0x64] ss:$8 sps:$4 sm:$0xff]  }
  0x8c   : > { %v1699_v14 = vld [vmem:[#allocation5 + $0x60] ss:$8 sps:$4 sm:$0xff]   ;;  %v1700_v15 = vld [vmem:[#allocation5 + $0x74] ss:$8 sps:$4 sm:$0xff]   ;;  %v1702_v16 = vld [vmem:[#allocation5 + $0x70] ss:$8 sps:$4 sm:$0xff]  }
  0x8d   : > { %v1703_v17 = vld [vmem:[#allocation5 + $0x84] ss:$8 sps:$4 sm:$0xff]   ;;  %v1753_v19 = vld [vmem:[#allocation7] ss:$8 sps:$4 sm:$0xff]   ;;  %v1754_v20 = vld [vmem:[#allocation7 + $0x14] ss:$8 sps:$4 sm:$0xff]  }
  0x8e   : > { %v1751_v18 = vld [vmem:[#allocation7 + $0x4] ss:$8 sps:$4 sm:$0xff]   ;;  %v1705_v21 = vld [vmem:[#allocation5 + $0x80] ss:$8 sps:$4 sm:$0xff]   ;;  %v1706_v22 = vld [vmem:[#allocation5 + $0x94] ss:$8 sps:$4 sm:$0xff]  }
  0x8f   : > { %889 = vmatprep.subr.bf16.mxu1 %v1751_v18  ;;  %v1756_v23 = vld [vmem:[#allocation7 + $0x10] ss:$8 sps:$4 sm:$0xff]   ;;  %v1757_v24 = vld [vmem:[#allocation7 + $0x24] ss:$8 sps:$4 sm:$0xff]   ;;  %v1759_v27 = vld [vmem:[#allocation7 + $0x20] ss:$8 sps:$4 sm:$0xff]  }
  0x90   : > { %890 = vmatpush1.bf16.xpose.msra.mxu1 %v1753_v19  ;;  %v1708_v25 = vld [vmem:[#allocation5 + $0x90] ss:$8 sps:$4 sm:$0xff]   ;;  %v1709_v26 = vld [vmem:[#allocation5 + $0xa4] ss:$8 sps:$4 sm:$0xff]   ;;  %v1760_v28 = vld [vmem:[#allocation7 + $0x34] ss:$8 sps:$4 sm:$0xff]  }
  0x91   : > { %571 = vmatpush1.bf16.xpose.msra.mxu0 %v1684_v3  ;;  %891 = vmatprep.subr.bf16.mxu1 %v1754_v20  ;;  %v1711_v29 = vld [vmem:[#allocation5 + $0xa0] ss:$8 sps:$4 sm:$0xff]   ;;  %v1712_v30 = vld [vmem:[#allocation5 + $0xb4] ss:$8 sps:$4 sm:$0xff]   ;;  %v1762_v31 = vld [vmem:[#allocation7 + $0x30] ss:$8 sps:$4 sm:$0xff]  }
  0x92   : > { %572 = vmatprep.subr.bf16.mxu0 %v1685_v4  ;;  %v1763_v32 = vld [vmem:[#allocation7 + $0x44] ss:$8 sps:$4 sm:$0xff]   ;;  %v1714_v33 = vld [vmem:[#allocation5 + $0xb0] ss:$8 sps:$4 sm:$0xff]   ;;  %v1765_v35 = vld [vmem:[#allocation7 + $0x40] ss:$8 sps:$4 sm:$0xff]  }
  0x93   : > { %v1715_v34 = vld [vmem:[#allocation5 + $0xc4] ss:$8 sps:$4 sm:$0xff]   ;;  %v1766_v36 = vld [vmem:[#allocation7 + $0x54] ss:$8 sps:$4 sm:$0xff]   ;;  %v1717_v37 = vld [vmem:[#allocation5 + $0xc0] ss:$8 sps:$4 sm:$0xff]  }
  0x94   : > { %v1718_v38 = vld [vmem:[#allocation5 + $0xd4] ss:$8 sps:$4 sm:$0xff]   ;;  %v1768_v39 = vld [vmem:[#allocation7 + $0x50] ss:$8 sps:$4 sm:$0xff]   ;;  %v1769_v40 = vld [vmem:[#allocation7 + $0x64] ss:$8 sps:$4 sm:$0xff]  }
  0x95   : > { %v1720_v41 = vld [vmem:[#allocation5 + $0xd0] ss:$8 sps:$4 sm:$0xff]   ;;  %v1721_v42 = vld [vmem:[#allocation5 + $0xe4] ss:$8 sps:$4 sm:$0xff]   ;;  %v1771_v43 = vld [vmem:[#allocation7 + $0x60] ss:$8 sps:$4 sm:$0xff]  }
  0x96   : > { %v1772_v44 = vld [vmem:[#allocation7 + $0x74] ss:$8 sps:$4 sm:$0xff]   ;;  %v1723_v45 = vld [vmem:[#allocation5 + $0xe0] ss:$8 sps:$4 sm:$0xff]   ;;  %v1774_v47 = vld [vmem:[#allocation7 + $0x70] ss:$8 sps:$4 sm:$0xff]  }
  0x97   : > { %v1724_v46 = vld [vmem:[#allocation5 + $0xf4] ss:$8 sps:$4 sm:$0xff]   ;;  %v1775_v48 = vld [vmem:[#allocation7 + $0x84] ss:$8 sps:$4 sm:$0xff]   ;;  %v1726_v49 = vld [vmem:[#allocation5 + $0xf0] ss:$8 sps:$4 sm:$0xff]  }
  0x98   : > { %892 = vmatpush1.bf16.xpose.msra.mxu1 %v1756_v23  ;;  %v1777_v50 = vld [vmem:[#allocation7 + $0x80] ss:$8 sps:$4 sm:$0xff]   ;;  %v1778_v51 = vld [vmem:[#allocation7 + $0x94] ss:$8 sps:$4 sm:$0xff]   ;;  %v1780_v54 = vld [vmem:[#allocation7 + $0x90] ss:$8 sps:$4 sm:$0xff]  }
  0x99   : > { %573 = vmatpush1.bf16.xpose.msra.mxu0 %v1687_v5  ;;  %893 = vmatprep.subr.bf16.mxu1 %v1757_v24  ;;  %v1727_v52 = vld [vmem:[%s2274_s15] ss:$8 sps:$4 sm:$0xff]   ;;  %v1730_v53 = vld [vmem:[%s2274_s15 + $0x14] ss:$8 sps:$4 sm:$0xff]   ;;  %v1781_v55 = vld [vmem:[#allocation7 + $0xa4] ss:$8 sps:$4 sm:$0xff]  }
  0x9a   : > { %574 = vmatprep.subr.bf16.mxu0 %v1688_v6  ;;  %v1732_v56 = vld [vmem:[%s2274_s15 + $0x10] ss:$8 sps:$4 sm:$0xff]   ;;  %v1733_v57 = vld [vmem:[%s2274_s15 + $0x24] ss:$8 sps:$4 sm:$0xff]   ;;  %v1783_v58 = vld [vmem:[#allocation7 + $0xa0] ss:$8 sps:$4 sm:$0xff]  }
  0x9b   : > { %v1784_v59 = vld [vmem:[#allocation7 + $0xb4] ss:$8 sps:$4 sm:$0xff]   ;;  %v1735_v60 = vld [vmem:[%s2274_s15 + $0x20] ss:$8 sps:$4 sm:$0xff]   ;;  %v1786_v62 = vld [vmem:[#allocation7 + $0xb0] ss:$8 sps:$4 sm:$0xff]  }
  0x9c   : > { %v1736_v61 = vld [vmem:[%s2274_s15 + $0x34] ss:$8 sps:$4 sm:$0xff]   ;;  %v1787_v63 = vld [vmem:[#allocation7 + $0xc4] ss:$8 sps:$4 sm:$0xff]   ;;  %v1738_v0 = vld [vmem:[%s2274_s15 + $0x30] ss:$8 sps:$4 sm:$0xff]  }
  0x9d   : > { %v1739_v1 = vld [vmem:[%s2274_s15 + $0x44] ss:$8 sps:$4 sm:$0xff]   ;;  %v1789_v2 = vld [vmem:[#allocation7 + $0xc0] ss:$8 sps:$4 sm:$0xff]   ;;  %v1790_v3 = vld [vmem:[#allocation7 + $0xd4] ss:$8 sps:$4 sm:$0xff]  }
  0x9e   : > { %v1741_v4 = vld [vmem:[%s2274_s15 + $0x40] ss:$8 sps:$4 sm:$0xff]   ;;  %v1742_v5 = vld [vmem:[%s2274_s15 + $0x54] ss:$8 sps:$4 sm:$0xff]   ;;  %v1792_v6 = vld [vmem:[#allocation7 + $0xd0] ss:$8 sps:$4 sm:$0xff]  }
  0x9f   : > { %v1793_v7 = vld [vmem:[#allocation7 + $0xe4] ss:$8 sps:$4 sm:$0xff]   ;;  %s2301_s4 = scalar_lea.vmem [#allocation8], %s2270_s2  ;;  %s1569_s25 = sshll.u32 %s2003_s18, 5 }
  0xa0   : > { %894 = vmatpush1.bf16.xpose.msra.mxu1 %v1759_v27  ;;  %s1528_s27 = sshll.u32 %s2007_s19, 6  ;;  %s1232_s30 = sshll.u32 %s2301_s4, 4  ;;  %s2332_s30 = int_to_ptr.vmem [resolvable:$true] %s1232_s30 }
  0xa1   : > { %575 = vmatpush1.bf16.xpose.msra.mxu0 %v1690_v8  ;;  %895 = vmatprep.subr.bf16.mxu1 %v1760_v28  ;;  %v1744_v8 = vld [vmem:[%s2274_s15 + $0x50] ss:$8 sps:$4 sm:$0xff]   ;;  %s2321_s29 = sadd.s32 %s1569_s25, %s1528_s27  ;;  %s1211_s14 = scalar_lea.sflag [#allocation4], %s2267_s7 }
  0xa2   : > { %576 = vmatprep.subr.bf16.mxu0 %v1691_v9  ;;  %v1745_v9 = vld [vmem:[%s2274_s15 + $0x64] ss:$8 sps:$4 sm:$0xff]   ;;  %s1529_s26 = sshll.u32 %s2321_s29, 6  ;;  %s1885_s18 = scalar_lea.vmem %s2332_s30, 2048 }
  0xa3   : > { %s2330_s13 = scalar_lea.hbm %s2448_s3, %s1529_s26  ;;  %p1886_p4 = scmp.ne.s32.totalorder %s2332_s30, %s1885_s18 }
  0xa4   : > { %s2026_s19 = smov [#allocation8]  }
  0xa5   : > { %p1887_p10 = pnand %p1886_p4, %p2203_p8  ;;  %s1889_s23 = sshll.u32 %s2026_s19, 4  ;;  %s1890_s23 = int_to_ptr.vmem [resolvable:$false] %s1889_s23 }
  0xa6   : > { %s1891_s24 = scalar_lea.vmem %s1890_s23, 4096  ;;  %p1892_p11 = scmp.lt.s32.totalorder %s2332_s30, %s1890_s23 }
  0xa7   : > { %p1888_p6 = pneg %p1887_p10  ;;  %p1893_p13 = scmp.lt.s32.totalorder %s1891_s24, %s1885_s18 }
  0xa8   : > { %896 = vmatpush1.bf16.xpose.msra.mxu1 %v1762_v31 }
  0xa9   : > { %577 = vmatpush1.bf16.xpose.msra.mxu0 %v1693_v10  ;;  %897 = vmatprep.subr.bf16.mxu1 %v1763_v32  ;;  %v1795_v10 = vld [vmem:[#allocation7 + $0xe0] ss:$8 sps:$4 sm:$0xff]   ;;  %p1894_p3 = por %p1893_p13, %p1892_p11 }
  0xaa   : > { %578 = vmatprep.subr.bf16.mxu0 %v1694_v11  ;;  %v1796_v11 = vld [vmem:[#allocation7 + $0xf4] ss:$8 sps:$4 sm:$0xff]  }
  0xab   : > { %p1895_p7 = pnand %p1894_p3, %p1888_p6 }
  0xb0   : > { %898 = vmatpush1.bf16.xpose.msra.mxu1 %v1765_v35 }
  0xb1   : > { %579 = vmatpush1.bf16.xpose.msra.mxu0 %v1696_v12  ;;  %899 = vmatprep.subr.bf16.mxu1 %v1766_v36  ;;  %v1747_v12 = vld [vmem:[%s2274_s15 + $0x60] ss:$8 sps:$4 sm:$0xff]  }
  0xb2   : > { %580 = vmatprep.subr.bf16.mxu0 %v1697_v13  ;;  %v1748_v13 = vld [vmem:[%s2274_s15 + $0x74] ss:$8 sps:$4 sm:$0xff]  }
  0xb8   : > { %900 = vmatpush1.bf16.xpose.msra.mxu1 %v1768_v39 }
  0xb9   : > { %581 = vmatpush1.bf16.xpose.msra.mxu0 %v1699_v14  ;;  %901 = vmatprep.subr.bf16.mxu1 %v1769_v40  ;;  %v1750_v14 = vld [vmem:[%s2274_s15 + $0x70] ss:$8 sps:$4 sm:$0xff]  }
  0xba   : > { %582 = vmatprep.subr.bf16.mxu0 %v1700_v15  ;;  %v1798_v15 = vld [vmem:[#allocation7 + $0xf0] ss:$8 sps:$4 sm:$0xff]  }
  0xc0   : > { %902 = vmatpush1.bf16.xpose.msra.mxu1 %v1771_v43 }
  0xc1   : > { %583 = vmatpush1.bf16.xpose.msra.mxu0 %v1702_v16  ;;  %903 = vmatprep.subr.bf16.mxu1 %v1772_v44 }
  0xc2   : > { %584 = vmatprep.subr.bf16.mxu0 %v1703_v17 }
  0xc8   : > { %904 = vmatpush1.bf16.xpose.msra.mxu1 %v1774_v47 }
  0xc9   : > { %585 = vmatpush1.bf16.xpose.msra.mxu0 %v1705_v21  ;;  %905 = vmatprep.subr.bf16.mxu1 %v1775_v48 }
  0xca   : > { %586 = vmatprep.subr.bf16.mxu0 %v1706_v22 }
  0xd0   : > { %906 = vmatpush1.bf16.xpose.msra.mxu1 %v1777_v50 }
  0xd1   : > { %587 = vmatpush1.bf16.xpose.msra.mxu0 %v1708_v25  ;;  %907 = vmatprep.subr.bf16.mxu1 %v1778_v51 }
  0xd2   : > { %588 = vmatprep.subr.bf16.mxu0 %v1709_v26 }
  0xd8   : > { %908 = vmatpush1.bf16.xpose.msra.mxu1 %v1780_v54 }
  0xd9   : > { %589 = vmatpush1.bf16.xpose.msra.mxu0 %v1711_v29  ;;  %909 = vmatprep.subr.bf16.mxu1 %v1781_v55 }
  0xda   : > { %590 = vmatprep.subr.bf16.mxu0 %v1712_v30 }
  0xe0   : > { %910 = vmatpush1.bf16.xpose.msra.mxu1 %v1783_v58 }
  0xe1   : > { %591 = vmatpush1.bf16.xpose.msra.mxu0 %v1714_v33  ;;  %911 = vmatprep.subr.bf16.mxu1 %v1784_v59 }
  0xe2   : > { %592 = vmatprep.subr.bf16.mxu0 %v1715_v34 }
  0xe8   : > { %912 = vmatpush1.bf16.xpose.msra.mxu1 %v1786_v62 }
  0xe9   : > { %593 = vmatpush1.bf16.xpose.msra.mxu0 %v1717_v37  ;;  %913 = vmatprep.subr.bf16.mxu1 %v1787_v63 }
  0xea   : > { %594 = vmatprep.subr.bf16.mxu0 %v1718_v38 }
  0xf0   : > { %914 = vmatpush1.bf16.xpose.msra.mxu1 %v1789_v2 }
  0xf1   : > { %595 = vmatpush1.bf16.xpose.msra.mxu0 %v1720_v41  ;;  %915 = vmatprep.subr.bf16.mxu1 %v1790_v3 }
  0xf2   : > { %596 = vmatprep.subr.bf16.mxu0 %v1721_v42 }
  0xf8   : > { %916 = vmatpush1.bf16.xpose.msra.mxu1 %v1792_v6 }
  0xf9   : > { %597 = vmatpush1.bf16.xpose.msra.mxu0 %v1723_v45  ;;  %917 = vmatprep.subr.bf16.mxu1 %v1793_v7 }
  0xfa   : > { %598 = vmatprep.subr.bf16.mxu0 %v1724_v46 }
 0x100   : > { %918 = vmatpush1.bf16.xpose.msra.mxu1 %v1795_v10 }
 0x101   : > { %599 = vmatpush1.bf16.xpose.msra.mxu0 %v1726_v49  ;;  %919 = vmatprep.subr.bf16.mxu1 %v1796_v11 }
 0x108   : > { %601 = vmatmul.mubr.bf16.vlgmr.msra.gmra.mrb[0].mxu0 %v1727_v52  ;;  %920 = vmatpush1.bf16.xpose.msra.mxu1 %v1798_v15 }
 0x109   : > { %610 = vmatprep.mubr.bf16.mxu0 %v1730_v53 }
 0x110   : > { %611 = vmatmul.mubr.bf16.gmra.mrb[4].mxu0 %v1732_v56 }
 0x111   : > { %620 = vmatprep.mubr.bf16.mxu0 %v1733_v57 }
 0x118   : > { %621 = vmatmul.mubr.bf16.gmra.mrb[8].mxu0 %v1735_v60 }
 0x119   : > { %630 = vmatprep.mubr.bf16.mxu0 %v1736_v61 }
 0x120   : > { %631 = vmatmul.mubr.bf16.gmra.mrb[12].mxu0 %v1738_v0 }
 0x121   : > { %640 = vmatprep.mubr.bf16.mxu0 %v1739_v1 }
 0x128   : > { %641 = vmatmul.mubr.bf16.gmra.mrb[16].mxu0 %v1741_v4 }
 0x129   : > { %650 = vmatprep.mubr.bf16.mxu0 %v1742_v5 }
 0x130   : > { %651 = vmatmul.mubr.bf16.gmra.mrb[20].mxu0 %v1744_v8 }
 0x131   : > { %660 = vmatprep.mubr.bf16.mxu0 %v1745_v9 }
 0x138   : > { %661 = vmatmul.mubr.bf16.gmra.mrb[24].mxu0 %v1747_v12 }
 0x139   : > { %670 = vmatprep.mubr.bf16.mxu0 %v1748_v13 }
 0x140   : > { %671 = vmatmul.mubr.bf16.gmra.mrb[28].mxu0 %v1750_v14 }
 0x1db   : > { %v602_v16 = vpop.f32.mrb[0].mxu0 }
 0x1dc   : > { %v604_v17 = vpop.f32.mrb[1].mxu0 }
 0x1dd   : > { %v1537_v18 = vpack.c.bf16 %v604_v17, %v602_v16  ;;  %v606_v19 = vpop.f32.mrb[2].mxu0 }
 0x1de   : > { %v681_v20 = vpack.c.bf16 %v606_v19, %v602_v16  ;;  %v608_v21 = vpop.f32.mrb[3].mxu0 }
 0x1df   : > { %1082 = vst [vmem:[%s2301_s4] sm:$0xff] %v1537_v18  ;;  %v1538_v22 = vpack.c.bf16 %v608_v21, %v606_v19  ;;  %v682_v23 = vpack.c.bf16 %v608_v21, %v604_v17 }
 0x1e1   : > { %1083 = vst [vmem:[%s2301_s4 + $0x8] sm:$0xff] %v1538_v22  ;;  %921 = vmatprep.mubr.bf16.mxu1 %v682_v23 }
 0x1e2   : > { %922 = vmatmul.mubr.bf16.vlgmr.msra.gmra.mrb[0].mxu1 %v681_v20 }
 0x1e3   : > { %v612_v24 = vpop.f32.mrb[4].mxu0 }
 0x1e4   : > { %v614_v25 = vpop.f32.mrb[5].mxu0 }
 0x1e5   : > { %v1539_v26 = vpack.c.bf16 %v614_v25, %v612_v24  ;;  %v616_v27 = vpop.f32.mrb[6].mxu0 }
 0x1e6   : > { %v683_v28 = vpack.c.bf16 %v616_v27, %v612_v24  ;;  %v618_v29 = vpop.f32.mrb[7].mxu0 }
 0x1e7   : > { %1084 = vst [vmem:[%s2301_s4 + $0x10] sm:$0xff] %v1539_v26  ;;  %v684_v30 = vpack.c.bf16 %v618_v29, %v614_v25  ;;  %v1540_v31 = vpack.c.bf16 %v618_v29, %v616_v27 }
 0x1e9   : > { %1085 = vst [vmem:[%s2301_s4 + $0x18] sm:$0xff] %v1540_v31  ;;  %931 = vmatprep.mubr.bf16.mxu1 %v684_v30 }
 0x1ea   : > { %932 = vmatmul.mubr.bf16.gmra.mrb[4].mxu1 %v683_v28 }
 0x1eb   : > { %v622_v32 = vpop.f32.mrb[8].mxu0 }
 0x1ec   : > { %v624_v33 = vpop.f32.mrb[9].mxu0 }
 0x1ed   : > { %v1541_v34 = vpack.c.bf16 %v624_v33, %v622_v32  ;;  %v626_v35 = vpop.f32.mrb[10].mxu0 }
 0x1ee   : > { %v685_v36 = vpack.c.bf16 %v626_v35, %v622_v32  ;;  %v628_v37 = vpop.f32.mrb[11].mxu0 }
 0x1ef   : > { %1086 = vst [vmem:[%s2301_s4 + $0x20] sm:$0xff] %v1541_v34  ;;  %v686_v38 = vpack.c.bf16 %v628_v37, %v624_v33  ;;  %v1542_v39 = vpack.c.bf16 %v628_v37, %v626_v35 }
 0x1f1   : > { %1087 = vst [vmem:[%s2301_s4 + $0x28] sm:$0xff] %v1542_v39  ;;  %941 = vmatprep.mubr.bf16.mxu1 %v686_v38 }
 0x1f2   : > { %942 = vmatmul.mubr.bf16.gmra.mrb[8].mxu1 %v685_v36 }
 0x1f3   : > { %v632_v40 = vpop.f32.mrb[12].mxu0 }
 0x1f4   : > { %v634_v41 = vpop.f32.mrb[13].mxu0 }
 0x1f5   : > { %v1543_v42 = vpack.c.bf16 %v634_v41, %v632_v40  ;;  %v636_v43 = vpop.f32.mrb[14].mxu0 }
 0x1f6   : > { %v687_v44 = vpack.c.bf16 %v636_v43, %v632_v40  ;;  %v638_v45 = vpop.f32.mrb[15].mxu0 }
 0x1f7   : > { %1088 = vst [vmem:[%s2301_s4 + $0x30] sm:$0xff] %v1543_v42  ;;  %v688_v46 = vpack.c.bf16 %v638_v45, %v634_v41  ;;  %v1544_v47 = vpack.c.bf16 %v638_v45, %v636_v43 }
 0x1f9   : > { %1089 = vst [vmem:[%s2301_s4 + $0x38] sm:$0xff] %v1544_v47  ;;  %951 = vmatprep.mubr.bf16.mxu1 %v688_v46 }
 0x1fa   : > { %952 = vmatmul.mubr.bf16.gmra.mrb[12].mxu1 %v687_v44 }
 0x1fb   : > { %v642_v48 = vpop.f32.mrb[16].mxu0 }
 0x1fc   : > { %v644_v49 = vpop.f32.mrb[17].mxu0 }
 0x1fd   : > { %v1545_v50 = vpack.c.bf16 %v644_v49, %v642_v48  ;;  %v646_v51 = vpop.f32.mrb[18].mxu0 }
 0x1fe   : > { %v689_v52 = vpack.c.bf16 %v646_v51, %v642_v48  ;;  %v648_v53 = vpop.f32.mrb[19].mxu0 }
 0x1ff   : > { %1090 = vst [vmem:[%s2301_s4 + $0x40] sm:$0xff] %v1545_v50  ;;  %v690_v54 = vpack.c.bf16 %v648_v53, %v644_v49  ;;  %v1546_v55 = vpack.c.bf16 %v648_v53, %v646_v51 }
 0x201   : > { %1091 = vst [vmem:[%s2301_s4 + $0x48] sm:$0xff] %v1546_v55  ;;  %961 = vmatprep.mubr.bf16.mxu1 %v690_v54 }
 0x202   : > { %962 = vmatmul.mubr.bf16.gmra.mrb[16].mxu1 %v689_v52 }
 0x203   : > { %v652_v56 = vpop.f32.mrb[20].mxu0 }
 0x204   : > { %v654_v57 = vpop.f32.mrb[21].mxu0 }
 0x205   : > { %v1547_v58 = vpack.c.bf16 %v654_v57, %v652_v56  ;;  %v656_v59 = vpop.f32.mrb[22].mxu0 }
 0x206   : > { %v691_v60 = vpack.c.bf16 %v656_v59, %v652_v56  ;;  %v658_v61 = vpop.f32.mrb[23].mxu0 }
 0x207   : > { %1092 = vst [vmem:[%s2301_s4 + $0x50] sm:$0xff] %v1547_v58  ;;  %v692_v62 = vpack.c.bf16 %v658_v61, %v654_v57  ;;  %v1548_v63 = vpack.c.bf16 %v658_v61, %v656_v59 }
 0x209   : > { %1093 = vst [vmem:[%s2301_s4 + $0x58] sm:$0xff] %v1548_v63  ;;  %971 = vmatprep.mubr.bf16.mxu1 %v692_v62 }
 0x20a   : > { %972 = vmatmul.mubr.bf16.gmra.mrb[20].mxu1 %v691_v60 }
 0x20b   : > { %v662_v0 = vpop.f32.mrb[24].mxu0 }
 0x20c   : > { %v664_v1 = vpop.f32.mrb[25].mxu0 }
 0x20d   : > { %v1549_v2 = vpack.c.bf16 %v664_v1, %v662_v0  ;;  %v666_v3 = vpop.f32.mrb[26].mxu0 }
 0x20e   : > { %v693_v4 = vpack.c.bf16 %v666_v3, %v662_v0  ;;  %v668_v5 = vpop.f32.mrb[27].mxu0 }
 0x20f   : > { %1094 = vst [vmem:[%s2301_s4 + $0x60] sm:$0xff] %v1549_v2  ;;  %v694_v6 = vpack.c.bf16 %v668_v5, %v664_v1  ;;  %v1550_v7 = vpack.c.bf16 %v668_v5, %v666_v3 }
 0x211   : > { %1095 = vst [vmem:[%s2301_s4 + $0x68] sm:$0xff] %v1550_v7  ;;  %981 = vmatprep.mubr.bf16.mxu1 %v694_v6 }
 0x212   : > { %982 = vmatmul.mubr.bf16.gmra.mrb[24].mxu1 %v693_v4 }
 0x213   : > { %v672_v8 = vpop.f32.mrb[28].mxu0 }
 0x214   : > { %v674_v9 = vpop.f32.mrb[29].mxu0 }
 0x215   : > { %v1551_v10 = vpack.c.bf16 %v674_v9, %v672_v8  ;;  %v676_v11 = vpop.f32.mrb[30].mxu0 }
 0x216   : > { %v695_v12 = vpack.c.bf16 %v676_v11, %v672_v8  ;;  %v678_v13 = vpop.f32.mrb[31].mxu0 }
 0x217   : > { %1096 = vst [vmem:[%s2301_s4 + $0x70] sm:$0xff] %v1551_v10  ;;  %v696_v14 = vpack.c.bf16 %v678_v13, %v674_v9  ;;  %v1552_v15 = vpack.c.bf16 %v678_v13, %v676_v11 }
 0x219   : > { %1097 = vst [vmem:[%s2301_s4 + $0x78] sm:$0xff] %v1552_v15  ;;  %991 = vmatprep.mubr.bf16.mxu1 %v696_v14 }
 0x21a   : > { %992 = vmatmul.mubr.bf16.gmra.mrb[28].mxu1 %v695_v12 }
 0x21b   : > { %1898 = shalt.err (!%p1895_p7)
}
 0x21c   : > { %s1899_s5 = scalar_lea.hbm %s2330_s13, 2048  ;;  %s1903_s12 = scalar_lea.hbm %s2448_s3, 8192 }
 0x21d   : > { %p1900_p12 = scmp.ne.s32.totalorder %s2330_s13, %s1899_s5  ;;  %p1904_p5 = scmp.lt.u32.totalorder %s2330_s13, %s2448_s3 }
 0x21e   : > { %p1905_p9 = scmp.lt.u32.totalorder %s1903_s12, %s1899_s5  ;;  %p1907_p4 = scmp.lt.u32.totalorder %s1899_s5, %s2330_s13 }
 0x21f   : > { %p1901_p1 = pnand %p1900_p12, %p2203_p8 }
 0x220   : > { %p1906_p0 = por %p1905_p9, %p1904_p5 }
 0x221   : > { %p1902_p2 = pneg %p1901_p1 }
 0x222   : > { %p1908_p10 = por %p1907_p4, %p1906_p0 }
 0x224   : > { %p1909_p6 = pnand %p1908_p10, %p1902_p2 }
 0x226   : > { %1912 = shalt.err (!%p1909_p6)
}
 0x227   : > { %s2027_s25 = smov 128   ;;  %s2028_s27 = smov 8  }
 0x228   : > { %1581 = dma.vmem_to_hbm [thread:$0]  (%p2203_p8), %s2332_s30, 2048, %s2330_s13, %s1211_s14, %s2027_s25, %s2027_s25, %s2028_s27  }
 0x229   : > { %s2362_s6 = scalar_lea.vmem [#allocation9], %s2270_s2  ;;  %s2483_s13 = sld [smem:[#allocation20_spill]] }
 0x22a   : > { %s1251_s2 = sshll.u32 %s2362_s6, 4  ;;  %s1216_s18 = scalar_lea.sflag [#allocation10], %s2267_s7  ;;  %s2387_s2 = int_to_ptr.vmem [resolvable:$true] %s1251_s2 }
 0x22b   : > { %s1913_s19 = scalar_lea.vmem %s2387_s2, 2048  ;;  %s2029_s23 = smov [#allocation9]  }
 0x22c   : > { %p1914_p11 = scmp.ne.s32.totalorder %s2387_s2, %s1913_s19  ;;  %s1917_s24 = sshll.u32 %s2029_s23, 4  ;;  %s1918_s24 = int_to_ptr.vmem [resolvable:$false] %s1917_s24 }
 0x22d   : > { %s1919_s29 = scalar_lea.vmem %s1918_s24, 4096  ;;  %p1920_p7 = scmp.lt.s32.totalorder %s2387_s2, %s1918_s24 }
 0x22e   : > { %p1915_p13 = pnand %p1914_p11, %p2203_p8  ;;  %p1921_p12 = scmp.lt.s32.totalorder %s1919_s29, %s1913_s19 }
 0x22f   : > { %s2385_s14 = scalar_lea.hbm %s2483_s13, %s1529_s26 }
 0x230   : > { %p1916_p3 = pneg %p1915_p13  ;;  %p1922_p1 = por %p1921_p12, %p1920_p7 }
 0x232   : > { %p1923_p2 = pnand %p1922_p1, %p1916_p3 }
 0x2b5   : > { %v923_v16 = vpop.f32.mrb[0].mxu1 }
 0x2b6   : > { %v925_v17 = vpop.f32.mrb[1].mxu1 }
 0x2b7   : > { %v1553_v18 = vpack.c.bf16 %v925_v17, %v923_v16  ;;  %v927_v19 = vpop.f32.mrb[2].mxu1 }
 0x2b8   : > { %v929_v20 = vpop.f32.mrb[3].mxu1 }
 0x2b9   : > { %1194 = vst [vmem:[%s2362_s6] sm:$0xff] %v1553_v18  ;;  %v1554_v21 = vpack.c.bf16 %v929_v20, %v927_v19 }
 0x2bb   : > { %1195 = vst [vmem:[%s2362_s6 + $0x8] sm:$0xff] %v1554_v21 }
 0x2bd   : > { %v933_v22 = vpop.f32.mrb[4].mxu1 }
 0x2be   : > { %v935_v23 = vpop.f32.mrb[5].mxu1 }
 0x2bf   : > { %v1555_v24 = vpack.c.bf16 %v935_v23, %v933_v22  ;;  %v937_v25 = vpop.f32.mrb[6].mxu1 }
 0x2c0   : > { %v939_v26 = vpop.f32.mrb[7].mxu1 }
 0x2c1   : > { %1196 = vst [vmem:[%s2362_s6 + $0x10] sm:$0xff] %v1555_v24  ;;  %v1556_v27 = vpack.c.bf16 %v939_v26, %v937_v25 }
 0x2c3   : > { %1197 = vst [vmem:[%s2362_s6 + $0x18] sm:$0xff] %v1556_v27 }
 0x2c5   : > { %v943_v28 = vpop.f32.mrb[8].mxu1 }
 0x2c6   : > { %v945_v29 = vpop.f32.mrb[9].mxu1 }
 0x2c7   : > { %v1557_v30 = vpack.c.bf16 %v945_v29, %v943_v28  ;;  %v947_v31 = vpop.f32.mrb[10].mxu1 }
 0x2c8   : > { %v949_v32 = vpop.f32.mrb[11].mxu1 }
 0x2c9   : > { %1198 = vst [vmem:[%s2362_s6 + $0x20] sm:$0xff] %v1557_v30  ;;  %v1558_v33 = vpack.c.bf16 %v949_v32, %v947_v31 }
 0x2cb   : > { %1199 = vst [vmem:[%s2362_s6 + $0x28] sm:$0xff] %v1558_v33 }
 0x2cd   : > { %v953_v34 = vpop.f32.mrb[12].mxu1 }
 0x2ce   : > { %v955_v35 = vpop.f32.mrb[13].mxu1 }
 0x2cf   : > { %v1559_v36 = vpack.c.bf16 %v955_v35, %v953_v34  ;;  %v957_v37 = vpop.f32.mrb[14].mxu1 }
 0x2d0   : > { %v959_v38 = vpop.f32.mrb[15].mxu1 }
 0x2d1   : > { %1200 = vst [vmem:[%s2362_s6 + $0x30] sm:$0xff] %v1559_v36  ;;  %v1560_v39 = vpack.c.bf16 %v959_v38, %v957_v37 }
 0x2d3   : > { %1201 = vst [vmem:[%s2362_s6 + $0x38] sm:$0xff] %v1560_v39 }
 0x2d5   : > { %v963_v40 = vpop.f32.mrb[16].mxu1 }
 0x2d6   : > { %v965_v41 = vpop.f32.mrb[17].mxu1 }
 0x2d7   : > { %v1561_v42 = vpack.c.bf16 %v965_v41, %v963_v40  ;;  %v967_v43 = vpop.f32.mrb[18].mxu1 }
 0x2d8   : > { %v969_v44 = vpop.f32.mrb[19].mxu1 }
 0x2d9   : > { %1202 = vst [vmem:[%s2362_s6 + $0x40] sm:$0xff] %v1561_v42  ;;  %v1562_v45 = vpack.c.bf16 %v969_v44, %v967_v43 }
 0x2db   : > { %1203 = vst [vmem:[%s2362_s6 + $0x48] sm:$0xff] %v1562_v45 }
 0x2dd   : > { %v973_v46 = vpop.f32.mrb[20].mxu1 }
 0x2de   : > { %v975_v47 = vpop.f32.mrb[21].mxu1 }
 0x2df   : > { %v1563_v48 = vpack.c.bf16 %v975_v47, %v973_v46  ;;  %v977_v49 = vpop.f32.mrb[22].mxu1 }
 0x2e0   : > { %v979_v50 = vpop.f32.mrb[23].mxu1 }
 0x2e1   : > { %1204 = vst [vmem:[%s2362_s6 + $0x50] sm:$0xff] %v1563_v48  ;;  %v1564_v51 = vpack.c.bf16 %v979_v50, %v977_v49 }
 0x2e3   : > { %1205 = vst [vmem:[%s2362_s6 + $0x58] sm:$0xff] %v1564_v51 }
 0x2e5   : > { %v983_v52 = vpop.f32.mrb[24].mxu1 }
 0x2e6   : > { %v985_v53 = vpop.f32.mrb[25].mxu1 }
 0x2e7   : > { %v1565_v54 = vpack.c.bf16 %v985_v53, %v983_v52  ;;  %v987_v55 = vpop.f32.mrb[26].mxu1 }
 0x2e8   : > { %v989_v56 = vpop.f32.mrb[27].mxu1 }
 0x2e9   : > { %1206 = vst [vmem:[%s2362_s6 + $0x60] sm:$0xff] %v1565_v54  ;;  %v1566_v57 = vpack.c.bf16 %v989_v56, %v987_v55 }
 0x2eb   : > { %1207 = vst [vmem:[%s2362_s6 + $0x68] sm:$0xff] %v1566_v57 }
 0x2ed   : > { %v993_v58 = vpop.f32.mrb[28].mxu1 }
 0x2ee   : > { %v995_v59 = vpop.f32.mrb[29].mxu1 }
 0x2ef   : > { %v1567_v60 = vpack.c.bf16 %v995_v59, %v993_v58  ;;  %v997_v61 = vpop.f32.mrb[30].mxu1 }
 0x2f0   : > { %v999_v62 = vpop.f32.mrb[31].mxu1 }
 0x2f1   : > { %1208 = vst [vmem:[%s2362_s6 + $0x70] sm:$0xff] %v1567_v60  ;;  %v1568_v63 = vpack.c.bf16 %v999_v62, %v997_v61 }
 0x2f3   : > { %1209 = vst [vmem:[%s2362_s6 + $0x78] sm:$0xff] %v1568_v63 }
 0x2f4   : > { %1926 = shalt.err (!%p1923_p2)
}
 0x2f5   : > { %s1927_s26 = scalar_lea.hbm %s2385_s14, 2048  ;;  %s1931_s9 = scalar_lea.hbm %s2483_s13, 8192 }
 0x2f6   : > { %p1928_p5 = scmp.ne.s32.totalorder %s2385_s14, %s1927_s26  ;;  %p1932_p4 = scmp.lt.u32.totalorder %s2385_s14, %s2483_s13 }
 0x2f7   : > { %p1933_p10 = scmp.lt.u32.totalorder %s1931_s9, %s1927_s26  ;;  %p1935_p11 = scmp.lt.u32.totalorder %s1927_s26, %s2385_s14 }
 0x2f8   : > { %p1929_p9 = pnand %p1928_p5, %p2203_p8 }
 0x2f9   : > { %p1934_p6 = por %p1933_p10, %p1932_p4 }
 0x2fa   : > { %p1930_p0 = pneg %p1929_p9 }
 0x2fb   : > { %p1936_p13 = por %p1935_p11, %p1934_p6 }
 0x2fd   : > { %p1937_p3 = pnand %p1936_p13, %p1930_p0 }
 0x2ff   : > { %1940 = shalt.err (!%p1937_p3)
}
 0x300   : > { %1582 = dma.vmem_to_hbm [thread:$0]  (%p2203_p8), %s2387_s2, 2048, %s2385_s14, %s1216_s18, %s2027_s25, %s2027_s25, %s2028_s27  }
 0x301 PF: > { %s2484_s4 = sld [smem:[#allocation15_spill]]  ;;  %s2485_s6 = sld [smem:[#allocation16_spill]] }
 0x302   : > { %p1608_p7 = scmp.ge.s32.totalorder %s2019_s22, 2 }
 0x307   : > { %s1266_s30 = sand.u32 1, %s2484_s4   ;;  %p2486_p12 = scmp.ne.s32.totalorder %s2485_s6, 0 }
 0x308   : > { %s1267_s11 = scalar_lea.sflag [#allocation4], %s1266_s30 }
 0x309   : > { %p1597_p1 = pnand %p1608_p7, %p2486_p12 }
 0x30b   : > { %1982 = dma.done.wait (!%p1597_p1), %s1267_s11, 2048  }
 0x30c   : > { %1984 = vsyncadd (!%p1597_p1), %s1267_s11, 4294965248  ;;  %s1276_s8 = scalar_lea.sflag [#allocation10], %s1266_s30 }
 0x30d   : > { %1986 = dma.done.wait (!%p1597_p1), %s1276_s8, 2048  }
 0x30e   : > { %1988 = vsyncadd (!%p1597_p1), %s1276_s8, 4294965248  ;;  %s25_s22 = sadd.s32 1, %s2019_s22   ;;  %s2487_s7 = sld [smem:[#allocation17_spill]] }
 0x30f   : > { %p22_p2 = scmp.ge.s32.totalorder %s25_s22, 6   ;;  %s2488_s15 = smov %s1995_s16 }
 0x310   : > { %s2489_s16 = smov %s1999_s17  ;;  %s2490_s17 = smov %s2216_s1 }
 0x311   : > { %s2491_s18 = smov %s2011_s20  ;;  %s2492_s19 = smov %s2015_s21 }
 0x312   : > { %s2494_s21 = smov %s2500_s10  ;;  %24 = sbr.rel (!%p22_p2) target bundleno = 14 (0xe), region = 102 }
 0x314   : > { %s2493_s20 = smov %s2487_s7 }
 0x319   :  { %1281 = vsyncpa [#allocation3], 1 }
 0x31a   :  { %1283 = vsyncpa [#allocation3 + $0x1], 1 }
 0x31b   :  { %1284 = vsyncpa [#allocation6], 1 }
 0x31c   :  { %1285 = vsyncpa [#allocation4], 1 }
 0x31d   :  { %1287 = vsyncpa [#allocation4 + $0x1], 1 }
 0x31e   :  { %1288 = vsyncpa [#allocation10], 1 }
 0x31f   :  { %1290 = vsyncpa [#allocation10 + $0x1], 1 }

// kernel: tpu_custom_call.1
= control target key start
LH: loop header
LB: loop body
LE: loop exit
PB: predicated region body
PF: predicated region fallthrough
CT: control target
= control target key end

     0   :  { %s2445_s0 = inlined_call_operand.hbm [shape: bf16[2,256,256], index: 0, kind: input, shape index: {}]   ;;  %s2446_s1 = inlined_call_operand.hbm [shape: bf16[256,256], index: 1, kind: input, shape index: {}]   ;;  %s2447_s2 = inlined_call_operand.hbm [shape: bf16[256,256], index: 2, kind: input, shape index: {}]   ;;  %s2448_s3 = inlined_call_operand.hbm [shape: bf16[2,256,256], index: 3, kind: output, shape index: {0}]   ;;  %s2449_s4 = inlined_call_operand.hbm [shape: bf16[2,256,256], index: 4, kind: output, shape index: {1}]  }
   0x1   :  { %2460 = sst [smem:[#allocation18_spill]] %s2446_s1 }
   0x2   :  { %2461 = sst [smem:[#allocation19_spill]] %s2447_s2 }
   0x3   :  { %2462 = sst [smem:[#allocation20_spill]] %s2449_s4 }
   0x4   :  { %10 = vsyncpa [#allocation3], 0 }
   0x5   :  { %12 = vsyncpa [#allocation3 + $0x1], 0 }
   0x6   :  { %13 = vsyncpa [#allocation6], 0 }
   0x7   :  { %14 = vsyncpa [#allocation4], 0 }
   0x8   :  { %16 = vsyncpa [#allocation4 + $0x1], 0 }
   0x9   :  { %17 = vsyncpa [#allocation10], 0 }
   0xa   :  { %19 = vsyncpa [#allocation10 + $0x1], 0  ;;  %s2055_s15 = smov 0   ;;  %s2057_s16 = smov 0  }
   0xb   :  { %s2059_s17 = smov 0   ;;  %s2061_s18 = smov 0  }
   0xc   :  { %s2063_s19 = smov 0   ;;  %s2065_s20 = smov 0  }
   0xd   :  { %s2067_s21 = smov 0   ;;  %s2069_s22 = smov 0  }
   0xe LB: > { %2463 = sst [smem:[#allocation15_spill]] %s1991_s15  ;;  %s1395_s23 = sadd.s32 4294967295, %s2019_s22   ;;  %s2019_s22 = sphi %s2069_s22, %s25_s22   ;;  %s2015_s21 = sphi %s2067_s21, %s2494_s21   ;;  %s2011_s20 = sphi %s2065_s20, %s2493_s20   ;;  %s2007_s19 = sphi %s2063_s19, %s2492_s19   ;;  %s2003_s18 = sphi %s2061_s18, %s2491_s18   ;;  %s1999_s17 = sphi %s2059_s17, %s2490_s17   ;;  %s1995_s16 = sphi %s2057_s16, %s2489_s16   ;;  %s1991_s15 = sphi %s2055_s15, %s2488_s15  }
   0xf   : > { %s1396_s24 = sadd.s32 4294967294, %s2019_s22   ;;  %p59_p0 = scmp.ne.s32.totalorder %s1995_s16, %s1991_s15 }
  0x10   : > { %p2099_p1 = scmp.eq.s32.totalorder %s1395_s23, 0  ;;  %p2103_p2 = scmp.eq.s32.totalorder %s1395_s23, 3 }
  0x11   : > { %p133_p3 = scmp.eq.s32.totalorder %s1396_s24, 3  ;;  %p1397_p5 = scmp.ge.s32.totalorder %s2019_s22, 1 }
  0x12   : > { %s2464_s25 = scalar_select %p2099_p1, 1, 0 }
  0x13   : > { %s2465_s26 = scalar_select %p2103_p2, 1, 0 }
  0x14   : > { %p2109_p4 = por %p2099_p1, %p59_p0  ;;  %p2114_p6 = por %p133_p3, %p59_p0 }
  0x15   : > { %p168_p7 = scmp.lt.s32.totalorder %s2019_s22, 5  ;;  %s2021_s30 = smov [#allocation5]  }
  0x16   : > { %s2466_s27 = scalar_select %p2109_p4, 1, 0 }
  0x17   : > { %s2467_s28 = scalar_select %p2114_p6, 1, 0 }
  0x18   : > { %p2119_p8 = pnand %p1397_p5, %p168_p7  ;;  %s180_s5 = sshll.u32 %s2021_s30, 4  ;;  %s181_s5 = int_to_ptr.vmem [resolvable:$true] %s180_s5 }
  0x19   : > { %2468 = sst [smem:[#allocation16_spill]] %s2467_s28  ;;  %s2022_s7 = smov [#allocation7]  }
  0x1a   : > { %s2469_s29 = scalar_select %p2119_p8, 1, 0 }
  0x1b   : > { %p1585_p9 = pneg %p2119_p8  ;;  %s193_s8 = sshll.u32 %s2022_s7, 4  ;;  %s2131_s8 = int_to_ptr.vmem [resolvable:$true] %s193_s8 }
  0x1c   : > { %s2471_s1 = sld [smem:[#allocation18_spill]] }
  0x1d   : > { %p2127_p10 = pnand %p1585_p9, %p2099_p1 }
  0x1f   : > { %p1801_p12 = pneg %p2127_p10 }
  0x22   : > { %s1799_s11 = scalar_lea.hbm %s2471_s1, 4096 }
  0x23   : > { %p1800_p11 = scmp.ne.s32.totalorder %s2471_s1, %s1799_s11  ;;  %p1806_p3 = scmp.lt.u32.totalorder %s1799_s11, %s2471_s1 }
  0x25   : > { %p1802_p13 = pnand %p1801_p12, %p1800_p11 }
  0x27   : > { %p1803_p0 = pneg %p1802_p13 }
  0x29   : > { %p1808_p5 = pnand %p1806_p3, %p1803_p0 }
  0x2b   : > { %1811 = shalt.err (!%p1808_p5)
}
  0x2c   : > { %s1812_s24 = scalar_lea.vmem %s181_s5, 4096  ;;  %p1820_p1 = scmp.lt.s32.totalorder %s181_s5, %s181_s5 }
  0x2d   : > { %p1813_p7 = scmp.ne.s32.totalorder %s181_s5, %s1812_s24  ;;  %p1821_p4 = scmp.lt.s32.totalorder %s1812_s24, %s1812_s24 }
  0x2f   : > { %p1815_p9 = pnand %p1813_p7, %p1801_p12  ;;  %p1822_p8 = por %p1821_p4, %p1820_p1 }
  0x31   : > { %p1816_p6 = pneg %p1815_p9 }
  0x33   : > { %p1823_p2 = pnand %p1822_p8, %p1816_p6 }
  0x35   : > { %1826 = shalt.err (!%p1823_p2)
}
  0x36   : > { %s2455_s30 = smov 128   ;;  %s2456_s7 = smov 8  }
  0x37   : > { %1588 = dma.hbm_to_vmem [thread:$0]  (!%p2127_p10), %s2471_s1, 4096, %s181_s5, [#allocation6], %s2455_s30, %s2455_s30, %s2456_s7  }
  0x38   : > { %s2472_s2 = sld [smem:[#allocation19_spill]] }
  0x3e   : > { %s1827_s13 = scalar_lea.hbm %s2472_s2, 4096 }
  0x3f   : > { %p1828_p1 = scmp.ne.s32.totalorder %s2472_s2, %s1827_s13  ;;  %p1834_p6 = scmp.lt.u32.totalorder %s1827_s13, %s2472_s2 }
  0x41   : > { %p1830_p2 = pnand %p1828_p1, %p1801_p12 }
  0x43   : > { %p1831_p4 = pneg %p1830_p2 }
  0x45   : > { %p1836_p8 = pnand %p1834_p6, %p1831_p4 }
  0x47   : > { %1839 = shalt.err (!%p1836_p8)
}
  0x48   : > { %s1840_s5 = scalar_lea.vmem %s2131_s8, 4096  ;;  %p1848_p3 = scmp.lt.s32.totalorder %s2131_s8, %s2131_s8 }
  0x49   : > { %p1841_p11 = scmp.ne.s32.totalorder %s2131_s8, %s1840_s5  ;;  %p1849_p5 = scmp.lt.s32.totalorder %s1840_s5, %s1840_s5 }
  0x4b   : > { %p1843_p13 = pnand %p1841_p11, %p1801_p12  ;;  %p1850_p7 = por %p1849_p5, %p1848_p3 }
  0x4d   : > { %p1844_p0 = pneg %p1843_p13 }
  0x4f   : > { %p1851_p9 = pnand %p1850_p7, %p1844_p0 }
  0x51   : > { %1854 = shalt.err (!%p1851_p9)
}
  0x52   : > { %1591 = dma.hbm_to_vmem [thread:$0]  (!%p2127_p10), %s2472_s2, 4096, %s2131_s8, [#allocation6], %s2455_s30, %s2455_s30, %s2456_s7  }
  0x53   : > { %s34_s6 = sadd.s32 1, %s2011_s20  ;;  %s37_s10 = sadd.s32 1, %s2015_s21 }
  0x54   : > { %p35_p12 = scmp.ge.s32.totalorder %s34_s6, 2  ;;  %s46_s11 = sadd.s32 1, %s1999_s17 }
  0x55   : > { %p53_p1 = scmp.ne.s32.totalorder %s1999_s17, %s1995_s16  ;;  %p54_p2 = scmp.eq.s32.totalorder %s2019_s22, 0 }
  0x56   : > { %s2496_s6 = smov (%p35_p12, %s34_s6), 0  ;;  %s2498_s10 = smov (!%p35_p12, %s37_s10), %s2015_s21 }
  0x57   : > { %2473 = sst [smem:[#allocation17_spill]] %s2496_s6  ;;  %s42_s12 = ssub.s32 %s2011_s20, %s2496_s6 }
  0x58   : > { %p2197_p4 = por %p54_p2, %p53_p1  ;;  %p39_p10 = scmp.ge.s32.totalorder %s2498_s10, 2 }
  0x59   : > { %p2475_p6 = scmp.ne.s32.totalorder %s2465_s26, 0  ;;  %p1605_p11 = scmp.lt.s32.totalorder %s2019_s22, 4 }
  0x5a   : > { %s207_s14 = sand.u32 1, %s1999_s17   ;;  %s2500_s10 = smov (%p39_p10, %s2498_s10), 0 }
  0x5b   : > { %p2203_p8 = por %p2475_p6, %p53_p1  ;;  %s1401_s23 = sshll.u32 %s207_s14, 7 }
  0x5c   : > { %s41_s24 = ssub.s32 %s2015_s21, %s2500_s10  ;;  %s1536_s28 = sshll.u32 %s2011_s20, 5 }
  0x5d   : > { %s43_s5 = sor.u32 %s42_s12, %s41_s24  ;;  %s1404_s9 = sshll.u32 %s2015_s21, 6 }
  0x5e   : > { %p44_p13 = scmp.eq.s32.totalorder %s43_s5, 0  ;;  %s218_s30 = sadd.s32 %s1536_s28, %s1404_s9 }
  0x5f   : > { %s211_s7 = scalar_lea.vmem [#allocation2], %s1401_s23  ;;  %s1405_s2 = sshll.u32 %s218_s30, 6 }
  0x60   : > { %s221_s26 = sshll.u32 %s211_s7, 4  ;;  %s2223_s4 = scalar_lea.hbm %s2445_s0, %s1405_s2  ;;  %s2218_s26 = int_to_ptr.vmem [resolvable:$true] %s221_s26 }
  0x61   : > { %s2216_s1 = scalar_select %p44_p13, %s1999_s17, %s46_s11  }
  0x62   : > { %p2229_p0 = pnand %p1605_p11, %p2197_p4  ;;  %s2233_s30 = scalar_lea.sflag [#allocation3], %s207_s14 }
  0x63   : > { %s1855_s7 = scalar_lea.hbm %s2223_s4, 2048  ;;  %s1860_s6 = scalar_lea.hbm %s2445_s0, 8192 }
  0x64   : > { %p1856_p3 = scmp.ne.s32.totalorder %s2223_s4, %s1855_s7  ;;  %p1857_p5 = pneg %p2229_p0 }
  0x65   : > { %p1861_p12 = scmp.lt.u32.totalorder %s2223_s4, %s2445_s0  ;;  %p1862_p1 = scmp.lt.u32.totalorder %s1860_s6, %s1855_s7 }
  0x66   : > { %p1858_p7 = pnand %p1857_p5, %p1856_p3  ;;  %p1864_p4 = scmp.lt.u32.totalorder %s1855_s7, %s2223_s4 }
  0x67   : > { %p1863_p2 = por %p1862_p1, %p1861_p12 }
  0x68   : > { %p1859_p9 = pneg %p1858_p7 }
  0x69   : > { %p1865_p10 = por %p1864_p4, %p1863_p2 }
  0x6b   : > { %p1866_p6 = pnand %p1865_p10, %p1859_p9 }
  0x6d   : > { %1869 = shalt.err (!%p1866_p6)
}
  0x6e   : > { %s1870_s14 = scalar_lea.vmem %s2218_s26, 2048  ;;  %s2025_s23 = smov [#allocation2]  }
  0x6f   : > { %p1871_p11 = scmp.ne.s32.totalorder %s2218_s26, %s1870_s14  ;;  %s1875_s24 = sshll.u32 %s2025_s23, 4  ;;  %s1876_s24 = int_to_ptr.vmem [resolvable:$false] %s1875_s24 }
  0x70   : > { %s1877_s5 = scalar_lea.vmem %s1876_s24, 4096  ;;  %p1878_p7 = scmp.lt.s32.totalorder %s2218_s26, %s1876_s24 }
  0x71   : > { %p1873_p13 = pnand %p1871_p11, %p1857_p5  ;;  %p1879_p12 = scmp.lt.s32.totalorder %s1877_s5, %s1870_s14 }
  0x73   : > { %p1874_p3 = pneg %p1873_p13  ;;  %p1880_p1 = por %p1879_p12, %p1878_p7 }
  0x75   : > { %p1881_p2 = pnand %p1880_p1, %p1874_p3 }
  0x77   : > { %1884 = shalt.err (!%p1881_p2)
}
  0x78   : > { %s2478_s28 = smov 8   ;;  %s2479_s9 = smov 128  }
  0x79   : > { %1595 = dma.hbm_to_vmem [thread:$0]  (!%p2229_p0), %s2223_s4, 2048, %s2218_s26, %s2233_s30, %s2479_s9, %s2479_s9, %s2478_s28  }
  0x7a   : > { %p2480_p5 = scmp.ne.s32.totalorder %s2469_s29, 0 }
  0x7b   : > { %s2267_s7 = sand.u32 (!%p2480_p5), 1, %s1995_s16   ;;  %p2481_p9 = scmp.ne.s32.totalorder (!%p2480_p5), %s2466_s27, 0 }
  0x7c   : > { %233 = sbr.rel (%p2480_p5) target bundleno = 769 (0x301), region = 32  ;;  %s2270_s2 = sshll.u32 (!%p2480_p5), %s2267_s7, 7 }
  0x7d   : > { %s236_s12 = scalar_lea.sflag (!%p2480_p5), [#allocation3], %s2267_s7  ;;  %s2274_s15 = scalar_lea.vmem (!%p2480_p5), [#allocation2], %s2270_s2 }
  0x83   : > { %1974 = dma.done.wait (%p2481_p9), %s236_s12, 2048  }
  0x84   : > { %1976 = vsyncadd (%p2481_p9), %s236_s12, 4294965248  ;;  %p2482_p0 = scmp.ne.s32.totalorder %s2464_s25, 0 }
  0x86   : > { %1978 = dma.done.wait (%p2482_p0), [#allocation6], 8192  }
  0x87   : > { %1980 = vsyncadd (%p2482_p0), [#allocation6], 4294959104  ;;  %v1679_v0 = vld [vmem:[#allocation5 + $0x4] ss:$8 sps:$4 sm:$0xff]   ;;  %v1681_v1 = vld [vmem:[#allocation5] ss:$8 sps:$4 sm:$0xff]  }
  0x88   : > { %568 = vmatprep.subr.bf16.mxu0 %v1679_v0  ;;  %v1682_v2 = vld [vmem:[#allocation5 + $0x14] ss:$8 sps:$4 sm:$0xff]   ;;  %v1684_v3 = vld [vmem:[#allocation5 + $0x10] ss:$8 sps:$4 sm:$0xff]   ;;  %v1685_v4 = vld [vmem:[#allocation5 + $0x24] ss:$8 sps:$4 sm:$0xff]  }
  0x89   : > { %569 = vmatpush1.bf16.xpose.msra.mxu0 %v1681_v1  ;;  %v1687_v5 = vld [vmem:[#allocation5 + $0x20] ss:$8 sps:$4 sm:$0xff]   ;;  %v1688_v6 = vld [vmem:[#allocation5 + $0x34] ss:$8 sps:$4 sm:$0xff]   ;;  %v1729_v7 = vld [vmem:[%s2274_s15 + $0x4] ss:$8 sps:$4 sm:$0xff]  }
  0x8a   : > { %570 = vmatprep.subr.bf16.mxu0 %v1682_v2  ;;  %v1690_v8 = vld [vmem:[#allocation5 + $0x30] ss:$8 sps:$4 sm:$0xff]   ;;  %v1691_v9 = vld [vmem:[#allocation5 + $0x44] ss:$8 sps:$4 sm:$0xff]   ;;  %600 = vmatprep.mubr.bf16.mxu0 %v1729_v7  ;;  %v1693_v10 = vld [vmem:[#allocation5 + $0x40] ss:$8 sps:$4 sm:$0xff]  }
  0x8b   : > { %v1694_v11 = vld [vmem:[#allocation5 + $0x54] ss:$8 sps:$4 sm:$0xff]   ;;  %v1696_v12 = vld [vmem:[#allocation5 + $0x50] ss:$8 sps:$4 sm:$0xff]   ;;  %v1697_v13 = vld [vmem:[#allocation5 + $0x64] ss:$8 sps:$4 sm:$0xff]  }
  0x8c   : > { %v1699_v14 = vld [vmem:[#allocation5 + $0x60] ss:$8 sps:$4 sm:$0xff]   ;;  %v1700_v15 = vld [vmem:[#allocation5 + $0x74] ss:$8 sps:$4 sm:$0xff]   ;;  %v1702_v16 = vld [vmem:[#allocation5 + $0x70] ss:$8 sps:$4 sm:$0xff]  }
  0x8d   : > { %v1703_v17 = vld [vmem:[#allocation5 + $0x84] ss:$8 sps:$4 sm:$0xff]   ;;  %v1753_v19 = vld [vmem:[#allocation7] ss:$8 sps:$4 sm:$0xff]   ;;  %v1754_v20 = vld [vmem:[#allocation7 + $0x14] ss:$8 sps:$4 sm:$0xff]  }
  0x8e   : > { %v1751_v18 = vld [vmem:[#allocation7 + $0x4] ss:$8 sps:$4 sm:$0xff]   ;;  %v1705_v21 = vld [vmem:[#allocation5 + $0x80] ss:$8 sps:$4 sm:$0xff]   ;;  %v1706_v22 = vld [vmem:[#allocation5 + $0x94] ss:$8 sps:$4 sm:$0xff]  }
  0x8f   : > { %889 = vmatprep.subr.bf16.mxu1 %v1751_v18  ;;  %v1756_v23 = vld [vmem:[#allocation7 + $0x10] ss:$8 sps:$4 sm:$0xff]   ;;  %v1757_v24 = vld [vmem:[#allocation7 + $0x24] ss:$8 sps:$4 sm:$0xff]   ;;  %v1759_v27 = vld [vmem:[#allocation7 + $0x20] ss:$8 sps:$4 sm:$0xff]  }
  0x90   : > { %890 = vmatpush1.bf16.xpose.msra.mxu1 %v1753_v19  ;;  %v1708_v25 = vld [vmem:[#allocation5 + $0x90] ss:$8 sps:$4 sm:$0xff]   ;;  %v1709_v26 = vld [vmem:[#allocation5 + $0xa4] ss:$8 sps:$4 sm:$0xff]   ;;  %v1760_v28 = vld [vmem:[#allocation7 + $0x34] ss:$8 sps:$4 sm:$0xff]  }
  0x91   : > { %571 = vmatpush1.bf16.xpose.msra.mxu0 %v1684_v3  ;;  %891 = vmatprep.subr.bf16.mxu1 %v1754_v20  ;;  %v1711_v29 = vld [vmem:[#allocation5 + $0xa0] ss:$8 sps:$4 sm:$0xff]   ;;  %v1712_v30 = vld [vmem:[#allocation5 + $0xb4] ss:$8 sps:$4 sm:$0xff]   ;;  %v1762_v31 = vld [vmem:[#allocation7 + $0x30] ss:$8 sps:$4 sm:$0xff]  }
  0x92   : > { %572 = vmatprep.subr.bf16.mxu0 %v1685_v4  ;;  %v1763_v32 = vld [vmem:[#allocation7 + $0x44] ss:$8 sps:$4 sm:$0xff]   ;;  %v1714_v33 = vld [vmem:[#allocation5 + $0xb0] ss:$8 sps:$4 sm:$0xff]   ;;  %v1765_v35 = vld [vmem:[#allocation7 + $0x40] ss:$8 sps:$4 sm:$0xff]  }
  0x93   : > { %v1715_v34 = vld [vmem:[#allocation5 + $0xc4] ss:$8 sps:$4 sm:$0xff]   ;;  %v1766_v36 = vld [vmem:[#allocation7 + $0x54] ss:$8 sps:$4 sm:$0xff]   ;;  %v1717_v37 = vld [vmem:[#allocation5 + $0xc0] ss:$8 sps:$4 sm:$0xff]  }
  0x94   : > { %v1718_v38 = vld [vmem:[#allocation5 + $0xd4] ss:$8 sps:$4 sm:$0xff]   ;;  %v1768_v39 = vld [vmem:[#allocation7 + $0x50] ss:$8 sps:$4 sm:$0xff]   ;;  %v1769_v40 = vld [vmem:[#allocation7 + $0x64] ss:$8 sps:$4 sm:$0xff]  }
  0x95   : > { %v1720_v41 = vld [vmem:[#allocation5 + $0xd0] ss:$8 sps:$4 sm:$0xff]   ;;  %v1721_v42 = vld [vmem:[#allocation5 + $0xe4] ss:$8 sps:$4 sm:$0xff]   ;;  %v1771_v43 = vld [vmem:[#allocation7 + $0x60] ss:$8 sps:$4 sm:$0xff]  }
  0x96   : > { %v1772_v44 = vld [vmem:[#allocation7 + $0x74] ss:$8 sps:$4 sm:$0xff]   ;;  %v1723_v45 = vld [vmem:[#allocation5 + $0xe0] ss:$8 sps:$4 sm:$0xff]   ;;  %v1774_v47 = vld [vmem:[#allocation7 + $0x70] ss:$8 sps:$4 sm:$0xff]  }
  0x97   : > { %v1724_v46 = vld [vmem:[#allocation5 + $0xf4] ss:$8 sps:$4 sm:$0xff]   ;;  %v1775_v48 = vld [vmem:[#allocation7 + $0x84] ss:$8 sps:$4 sm:$0xff]   ;;  %v1726_v49 = vld [vmem:[#allocation5 + $0xf0] ss:$8 sps:$4 sm:$0xff]  }
  0x98   : > { %892 = vmatpush1.bf16.xpose.msra.mxu1 %v1756_v23  ;;  %v1777_v50 = vld [vmem:[#allocation7 + $0x80] ss:$8 sps:$4 sm:$0xff]   ;;  %v1778_v51 = vld [vmem:[#allocation7 + $0x94] ss:$8 sps:$4 sm:$0xff]   ;;  %v1780_v54 = vld [vmem:[#allocation7 + $0x90] ss:$8 sps:$4 sm:$0xff]  }
  0x99   : > { %573 = vmatpush1.bf16.xpose.msra.mxu0 %v1687_v5  ;;  %893 = vmatprep.subr.bf16.mxu1 %v1757_v24  ;;  %v1727_v52 = vld [vmem:[%s2274_s15] ss:$8 sps:$4 sm:$0xff]   ;;  %v1730_v53 = vld [vmem:[%s2274_s15 + $0x14] ss:$8 sps:$4 sm:$0xff]   ;;  %v1781_v55 = vld [vmem:[#allocation7 + $0xa4] ss:$8 sps:$4 sm:$0xff]  }
  0x9a   : > { %574 = vmatprep.subr.bf16.mxu0 %v1688_v6  ;;  %v1732_v56 = vld [vmem:[%s2274_s15 + $0x10] ss:$8 sps:$4 sm:$0xff]   ;;  %v1733_v57 = vld [vmem:[%s2274_s15 + $0x24] ss:$8 sps:$4 sm:$0xff]   ;;  %v1783_v58 = vld [vmem:[#allocation7 + $0xa0] ss:$8 sps:$4 sm:$0xff]  }
  0x9b   : > { %v1784_v59 = vld [vmem:[#allocation7 + $0xb4] ss:$8 sps:$4 sm:$0xff]   ;;  %v1735_v60 = vld [vmem:[%s2274_s15 + $0x20] ss:$8 sps:$4 sm:$0xff]   ;;  %v1786_v62 = vld [vmem:[#allocation7 + $0xb0] ss:$8 sps:$4 sm:$0xff]  }
  0x9c   : > { %v1736_v61 = vld [vmem:[%s2274_s15 + $0x34] ss:$8 sps:$4 sm:$0xff]   ;;  %v1787_v63 = vld [vmem:[#allocation7 + $0xc4] ss:$8 sps:$4 sm:$0xff]   ;;  %v1738_v0 = vld [vmem:[%s2274_s15 + $0x30] ss:$8 sps:$4 sm:$0xff]  }
  0x9d   : > { %v1739_v1 = vld [vmem:[%s2274_s15 + $0x44] ss:$8 sps:$4 sm:$0xff]   ;;  %v1789_v2 = vld [vmem:[#allocation7 + $0xc0] ss:$8 sps:$4 sm:$0xff]   ;;  %v1790_v3 = vld [vmem:[#allocation7 + $0xd4] ss:$8 sps:$4 sm:$0xff]  }
  0x9e   : > { %v1741_v4 = vld [vmem:[%s2274_s15 + $0x40] ss:$8 sps:$4 sm:$0xff]   ;;  %v1742_v5 = vld [vmem:[%s2274_s15 + $0x54] ss:$8 sps:$4 sm:$0xff]   ;;  %v1792_v6 = vld [vmem:[#allocation7 + $0xd0] ss:$8 sps:$4 sm:$0xff]  }
  0x9f   : > { %v1793_v7 = vld [vmem:[#allocation7 + $0xe4] ss:$8 sps:$4 sm:$0xff]   ;;  %s2301_s4 = scalar_lea.vmem [#allocation8], %s2270_s2  ;;  %s1569_s25 = sshll.u32 %s2003_s18, 5 }
  0xa0   : > { %894 = vmatpush1.bf16.xpose.msra.mxu1 %v1759_v27  ;;  %s1528_s27 = sshll.u32 %s2007_s19, 6  ;;  %s1232_s30 = sshll.u32 %s2301_s4, 4  ;;  %s2332_s30 = int_to_ptr.vmem [resolvable:$true] %s1232_s30 }
  0xa1   : > { %575 = vmatpush1.bf16.xpose.msra.mxu0 %v1690_v8  ;;  %895 = vmatprep.subr.bf16.mxu1 %v1760_v28  ;;  %v1744_v8 = vld [vmem:[%s2274_s15 + $0x50] ss:$8 sps:$4 sm:$0xff]   ;;  %s2321_s29 = sadd.s32 %s1569_s25, %s1528_s27  ;;  %s1211_s14 = scalar_lea.sflag [#allocation4], %s2267_s7 }
  0xa2   : > { %576 = vmatprep.subr.bf16.mxu0 %v1691_v9  ;;  %v1745_v9 = vld [vmem:[%s2274_s15 + $0x64] ss:$8 sps:$4 sm:$0xff]   ;;  %s1529_s26 = sshll.u32 %s2321_s29, 6  ;;  %s1885_s18 = scalar_lea.vmem %s2332_s30, 2048 }
  0xa3   : > { %s2330_s13 = scalar_lea.hbm %s2448_s3, %s1529_s26  ;;  %p1886_p4 = scmp.ne.s32.totalorder %s2332_s30, %s1885_s18 }
  0xa4   : > { %s2026_s19 = smov [#allocation8]  }
  0xa5   : > { %p1887_p10 = pnand %p1886_p4, %p2203_p8  ;;  %s1889_s23 = sshll.u32 %s2026_s19, 4  ;;  %s1890_s23 = int_to_ptr.vmem [resolvable:$false] %s1889_s23 }
  0xa6   : > { %s1891_s24 = scalar_lea.vmem %s1890_s23, 4096  ;;  %p1892_p11 = scmp.lt.s32.totalorder %s2332_s30, %s1890_s23 }
  0xa7   : > { %p1888_p6 = pneg %p1887_p10  ;;  %p1893_p13 = scmp.lt.s32.totalorder %s1891_s24, %s1885_s18 }
  0xa8   : > { %896 = vmatpush1.bf16.xpose.msra.mxu1 %v1762_v31 }
  0xa9   : > { %577 = vmatpush1.bf16.xpose.msra.mxu0 %v1693_v10  ;;  %897 = vmatprep.subr.bf16.mxu1 %v1763_v32  ;;  %v1795_v10 = vld [vmem:[#allocation7 + $0xe0] ss:$8 sps:$4 sm:$0xff]   ;;  %p1894_p3 = por %p1893_p13, %p1892_p11 }
  0xaa   : > { %578 = vmatprep.subr.bf16.mxu0 %v1694_v11  ;;  %v1796_v11 = vld [vmem:[#allocation7 + $0xf4] ss:$8 sps:$4 sm:$0xff]  }
  0xab   : > { %p1895_p7 = pnand %p1894_p3, %p1888_p6 }
  0xb0   : > { %898 = vmatpush1.bf16.xpose.msra.mxu1 %v1765_v35 }
  0xb1   : > { %579 = vmatpush1.bf16.xpose.msra.mxu0 %v1696_v12  ;;  %899 = vmatprep.subr.bf16.mxu1 %v1766_v36  ;;  %v1747_v12 = vld [vmem:[%s2274_s15 + $0x60] ss:$8 sps:$4 sm:$0xff]  }
  0xb2   : > { %580 = vmatprep.subr.bf16.mxu0 %v1697_v13  ;;  %v1748_v13 = vld [vmem:[%s2274_s15 + $0x74] ss:$8 sps:$4 sm:$0xff]  }
  0xb8   : > { %900 = vmatpush1.bf16.xpose.msra.mxu1 %v1768_v39 }
  0xb9   : > { %581 = vmatpush1.bf16.xpose.msra.mxu0 %v1699_v14  ;;  %901 = vmatprep.subr.bf16.mxu1 %v1769_v40  ;;  %v1750_v14 = vld [vmem:[%s2274_s15 + $0x70] ss:$8 sps:$4 sm:$0xff]  }
  0xba   : > { %582 = vmatprep.subr.bf16.mxu0 %v1700_v15  ;;  %v1798_v15 = vld [vmem:[#allocation7 + $0xf0] ss:$8 sps:$4 sm:$0xff]  }
  0xc0   : > { %902 = vmatpush1.bf16.xpose.msra.mxu1 %v1771_v43 }
  0xc1   : > { %583 = vmatpush1.bf16.xpose.msra.mxu0 %v1702_v16  ;;  %903 = vmatprep.subr.bf16.mxu1 %v1772_v44 }
  0xc2   : > { %584 = vmatprep.subr.bf16.mxu0 %v1703_v17 }
  0xc8   : > { %904 = vmatpush1.bf16.xpose.msra.mxu1 %v1774_v47 }
  0xc9   : > { %585 = vmatpush1.bf16.xpose.msra.mxu0 %v1705_v21  ;;  %905 = vmatprep.subr.bf16.mxu1 %v1775_v48 }
  0xca   : > { %586 = vmatprep.subr.bf16.mxu0 %v1706_v22 }
  0xd0   : > { %906 = vmatpush1.bf16.xpose.msra.mxu1 %v1777_v50 }
  0xd1   : > { %587 = vmatpush1.bf16.xpose.msra.mxu0 %v1708_v25  ;;  %907 = vmatprep.subr.bf16.mxu1 %v1778_v51 }
  0xd2   : > { %588 = vmatprep.subr.bf16.mxu0 %v1709_v26 }
  0xd8   : > { %908 = vmatpush1.bf16.xpose.msra.mxu1 %v1780_v54 }
  0xd9   : > { %589 = vmatpush1.bf16.xpose.msra.mxu0 %v1711_v29  ;;  %909 = vmatprep.subr.bf16.mxu1 %v1781_v55 }
  0xda   : > { %590 = vmatprep.subr.bf16.mxu0 %v1712_v30 }
  0xe0   : > { %910 = vmatpush1.bf16.xpose.msra.mxu1 %v1783_v58 }
  0xe1   : > { %591 = vmatpush1.bf16.xpose.msra.mxu0 %v1714_v33  ;;  %911 = vmatprep.subr.bf16.mxu1 %v1784_v59 }
  0xe2   : > { %592 = vmatprep.subr.bf16.mxu0 %v1715_v34 }
  0xe8   : > { %912 = vmatpush1.bf16.xpose.msra.mxu1 %v1786_v62 }
  0xe9   : > { %593 = vmatpush1.bf16.xpose.msra.mxu0 %v1717_v37  ;;  %913 = vmatprep.subr.bf16.mxu1 %v1787_v63 }
  0xea   : > { %594 = vmatprep.subr.bf16.mxu0 %v1718_v38 }
  0xf0   : > { %914 = vmatpush1.bf16.xpose.msra.mxu1 %v1789_v2 }
  0xf1   : > { %595 = vmatpush1.bf16.xpose.msra.mxu0 %v1720_v41  ;;  %915 = vmatprep.subr.bf16.mxu1 %v1790_v3 }
  0xf2   : > { %596 = vmatprep.subr.bf16.mxu0 %v1721_v42 }
  0xf8   : > { %916 = vmatpush1.bf16.xpose.msra.mxu1 %v1792_v6 }
  0xf9   : > { %597 = vmatpush1.bf16.xpose.msra.mxu0 %v1723_v45  ;;  %917 = vmatprep.subr.bf16.mxu1 %v1793_v7 }
  0xfa   : > { %598 = vmatprep.subr.bf16.mxu0 %v1724_v46 }
 0x100   : > { %918 = vmatpush1.bf16.xpose.msra.mxu1 %v1795_v10 }
 0x101   : > { %599 = vmatpush1.bf16.xpose.msra.mxu0 %v1726_v49  ;;  %919 = vmatprep.subr.bf16.mxu1 %v1796_v11 }
 0x108   : > { %601 = vmatmul.mubr.bf16.vlgmr.msra.gmra.mrb[0].mxu0 %v1727_v52  ;;  %920 = vmatpush1.bf16.xpose.msra.mxu1 %v1798_v15 }
 0x109   : > { %610 = vmatprep.mubr.bf16.mxu0 %v1730_v53 }
 0x110   : > { %611 = vmatmul.mubr.bf16.gmra.mrb[4].mxu0 %v1732_v56 }
 0x111   : > { %620 = vmatprep.mubr.bf16.mxu0 %v1733_v57 }
 0x118   : > { %621 = vmatmul.mubr.bf16.gmra.mrb[8].mxu0 %v1735_v60 }
 0x119   : > { %630 = vmatprep.mubr.bf16.mxu0 %v1736_v61 }
 0x120   : > { %631 = vmatmul.mubr.bf16.gmra.mrb[12].mxu0 %v1738_v0 }
 0x121   : > { %640 = vmatprep.mubr.bf16.mxu0 %v1739_v1 }
 0x128   : > { %641 = vmatmul.mubr.bf16.gmra.mrb[16].mxu0 %v1741_v4 }
 0x129   : > { %650 = vmatprep.mubr.bf16.mxu0 %v1742_v5 }
 0x130   : > { %651 = vmatmul.mubr.bf16.gmra.mrb[20].mxu0 %v1744_v8 }
 0x131   : > { %660 = vmatprep.mubr.bf16.mxu0 %v1745_v9 }
 0x138   : > { %661 = vmatmul.mubr.bf16.gmra.mrb[24].mxu0 %v1747_v12 }
 0x139   : > { %670 = vmatprep.mubr.bf16.mxu0 %v1748_v13 }
 0x140   : > { %671 = vmatmul.mubr.bf16.gmra.mrb[28].mxu0 %v1750_v14 }
 0x1db   : > { %v602_v16 = vpop.f32.mrb[0].mxu0 }
 0x1dc   : > { %v604_v17 = vpop.f32.mrb[1].mxu0 }
 0x1dd   : > { %v1537_v18 = vpack.c.bf16 %v604_v17, %v602_v16  ;;  %v606_v19 = vpop.f32.mrb[2].mxu0 }
 0x1de   : > { %v681_v20 = vpack.c.bf16 %v606_v19, %v602_v16  ;;  %v608_v21 = vpop.f32.mrb[3].mxu0 }
 0x1df   : > { %1082 = vst [vmem:[%s2301_s4] sm:$0xff] %v1537_v18  ;;  %v1538_v22 = vpack.c.bf16 %v608_v21, %v606_v19  ;;  %v682_v23 = vpack.c.bf16 %v608_v21, %v604_v17 }
 0x1e1   : > { %1083 = vst [vmem:[%s2301_s4 + $0x8] sm:$0xff] %v1538_v22  ;;  %921 = vmatprep.mubr.bf16.mxu1 %v682_v23 }
 0x1e2   : > { %922 = vmatmul.mubr.bf16.vlgmr.msra.gmra.mrb[0].mxu1 %v681_v20 }
 0x1e3   : > { %v612_v24 = vpop.f32.mrb[4].mxu0 }
 0x1e4   : > { %v614_v25 = vpop.f32.mrb[5].mxu0 }
 0x1e5   : > { %v1539_v26 = vpack.c.bf16 %v614_v25, %v612_v24  ;;  %v616_v27 = vpop.f32.mrb[6].mxu0 }
 0x1e6   : > { %v683_v28 = vpack.c.bf16 %v616_v27, %v612_v24  ;;  %v618_v29 = vpop.f32.mrb[7].mxu0 }
 0x1e7   : > { %1084 = vst [vmem:[%s2301_s4 + $0x10] sm:$0xff] %v1539_v26  ;;  %v684_v30 = vpack.c.bf16 %v618_v29, %v614_v25  ;;  %v1540_v31 = vpack.c.bf16 %v618_v29, %v616_v27 }
 0x1e9   : > { %1085 = vst [vmem:[%s2301_s4 + $0x18] sm:$0xff] %v1540_v31  ;;  %931 = vmatprep.mubr.bf16.mxu1 %v684_v30 }
 0x1ea   : > { %932 = vmatmul.mubr.bf16.gmra.mrb[4].mxu1 %v683_v28 }
 0x1eb   : > { %v622_v32 = vpop.f32.mrb[8].mxu0 }
 0x1ec   : > { %v624_v33 = vpop.f32.mrb[9].mxu0 }
 0x1ed   : > { %v1541_v34 = vpack.c.bf16 %v624_v33, %v622_v32  ;;  %v626_v35 = vpop.f32.mrb[10].mxu0 }
 0x1ee   : > { %v685_v36 = vpack.c.bf16 %v626_v35, %v622_v32  ;;  %v628_v37 = vpop.f32.mrb[11].mxu0 }
 0x1ef   : > { %1086 = vst [vmem:[%s2301_s4 + $0x20] sm:$0xff] %v1541_v34  ;;  %v686_v38 = vpack.c.bf16 %v628_v37, %v624_v33  ;;  %v1542_v39 = vpack.c.bf16 %v628_v37, %v626_v35 }
 0x1f1   : > { %1087 = vst [vmem:[%s2301_s4 + $0x28] sm:$0xff] %v1542_v39  ;;  %941 = vmatprep.mubr.bf16.mxu1 %v686_v38 }
 0x1f2   : > { %942 = vmatmul.mubr.bf16.gmra.mrb[8].mxu1 %v685_v36 }
 0x1f3   : > { %v632_v40 = vpop.f32.mrb[12].mxu0 }
 0x1f4   : > { %v634_v41 = vpop.f32.mrb[13].mxu0 }
 0x1f5   : > { %v1543_v42 = vpack.c.bf16 %v634_v41, %v632_v40  ;;  %v636_v43 = vpop.f32.mrb[14].mxu0 }
 0x1f6   : > { %v687_v44 = vpack.c.bf16 %v636_v43, %v632_v40  ;;  %v638_v45 = vpop.f32.mrb[15].mxu0 }
 0x1f7   : > { %1088 = vst [vmem:[%s2301_s4 + $0x30] sm:$0xff] %v1543_v42  ;;  %v688_v46 = vpack.c.bf16 %v638_v45, %v634_v41  ;;  %v1544_v47 = vpack.c.bf16 %v638_v45, %v636_v43 }
 0x1f9   : > { %1089 = vst [vmem:[%s2301_s4 + $0x38] sm:$0xff] %v1544_v47  ;;  %951 = vmatprep.mubr.bf16.mxu1 %v688_v46 }
 0x1fa   : > { %952 = vmatmul.mubr.bf16.gmra.mrb[12].mxu1 %v687_v44 }
 0x1fb   : > { %v642_v48 = vpop.f32.mrb[16].mxu0 }
 0x1fc   : > { %v644_v49 = vpop.f32.mrb[17].mxu0 }
 0x1fd   : > { %v1545_v50 = vpack.c.bf16 %v644_v49, %v642_v48  ;;  %v646_v51 = vpop.f32.mrb[18].mxu0 }
 0x1fe   : > { %v689_v52 = vpack.c.bf16 %v646_v51, %v642_v48  ;;  %v648_v53 = vpop.f32.mrb[19].mxu0 }
 0x1ff   : > { %1090 = vst [vmem:[%s2301_s4 + $0x40] sm:$0xff] %v1545_v50  ;;  %v690_v54 = vpack.c.bf16 %v648_v53, %v644_v49  ;;  %v1546_v55 = vpack.c.bf16 %v648_v53, %v646_v51 }
 0x201   : > { %1091 = vst [vmem:[%s2301_s4 + $0x48] sm:$0xff] %v1546_v55  ;;  %961 = vmatprep.mubr.bf16.mxu1 %v690_v54 }
 0x202   : > { %962 = vmatmul.mubr.bf16.gmra.mrb[16].mxu1 %v689_v52 }
 0x203   : > { %v652_v56 = vpop.f32.mrb[20].mxu0 }
 0x204   : > { %v654_v57 = vpop.f32.mrb[21].mxu0 }
 0x205   : > { %v1547_v58 = vpack.c.bf16 %v654_v57, %v652_v56  ;;  %v656_v59 = vpop.f32.mrb[22].mxu0 }
 0x206   : > { %v691_v60 = vpack.c.bf16 %v656_v59, %v652_v56  ;;  %v658_v61 = vpop.f32.mrb[23].mxu0 }
 0x207   : > { %1092 = vst [vmem:[%s2301_s4 + $0x50] sm:$0xff] %v1547_v58  ;;  %v692_v62 = vpack.c.bf16 %v658_v61, %v654_v57  ;;  %v1548_v63 = vpack.c.bf16 %v658_v61, %v656_v59 }
 0x209   : > { %1093 = vst [vmem:[%s2301_s4 + $0x58] sm:$0xff] %v1548_v63  ;;  %971 = vmatprep.mubr.bf16.mxu1 %v692_v62 }
 0x20a   : > { %972 = vmatmul.mubr.bf16.gmra.mrb[20].mxu1 %v691_v60 }
 0x20b   : > { %v662_v0 = vpop.f32.mrb[24].mxu0 }
 0x20c   : > { %v664_v1 = vpop.f32.mrb[25].mxu0 }
 0x20d   : > { %v1549_v2 = vpack.c.bf16 %v664_v1, %v662_v0  ;;  %v666_v3 = vpop.f32.mrb[26].mxu0 }
 0x20e   : > { %v693_v4 = vpack.c.bf16 %v666_v3, %v662_v0  ;;  %v668_v5 = vpop.f32.mrb[27].mxu0 }
 0x20f   : > { %1094 = vst [vmem:[%s2301_s4 + $0x60] sm:$0xff] %v1549_v2  ;;  %v694_v6 = vpack.c.bf16 %v668_v5, %v664_v1  ;;  %v1550_v7 = vpack.c.bf16 %v668_v5, %v666_v3 }
 0x211   : > { %1095 = vst [vmem:[%s2301_s4 + $0x68] sm:$0xff] %v1550_v7  ;;  %981 = vmatprep.mubr.bf16.mxu1 %v694_v6 }
 0x212   : > { %982 = vmatmul.mubr.bf16.gmra.mrb[24].mxu1 %v693_v4 }
 0x213   : > { %v672_v8 = vpop.f32.mrb[28].mxu0 }
 0x214   : > { %v674_v9 = vpop.f32.mrb[29].mxu0 }
 0x215   : > { %v1551_v10 = vpack.c.bf16 %v674_v9, %v672_v8  ;;  %v676_v11 = vpop.f32.mrb[30].mxu0 }
 0x216   : > { %v695_v12 = vpack.c.bf16 %v676_v11, %v672_v8  ;;  %v678_v13 = vpop.f32.mrb[31].mxu0 }
 0x217   : > { %1096 = vst [vmem:[%s2301_s4 + $0x70] sm:$0xff] %v1551_v10  ;;  %v696_v14 = vpack.c.bf16 %v678_v13, %v674_v9  ;;  %v1552_v15 = vpack.c.bf16 %v678_v13, %v676_v11 }
 0x219   : > { %1097 = vst [vmem:[%s2301_s4 + $0x78] sm:$0xff] %v1552_v15  ;;  %991 = vmatprep.mubr.bf16.mxu1 %v696_v14 }
 0x21a   : > { %992 = vmatmul.mubr.bf16.gmra.mrb[28].mxu1 %v695_v12 }
 0x21b   : > { %1898 = shalt.err (!%p1895_p7)
}
 0x21c   : > { %s1899_s5 = scalar_lea.hbm %s2330_s13, 2048  ;;  %s1903_s12 = scalar_lea.hbm %s2448_s3, 8192 }
 0x21d   : > { %p1900_p12 = scmp.ne.s32.totalorder %s2330_s13, %s1899_s5  ;;  %p1904_p5 = scmp.lt.u32.totalorder %s2330_s13, %s2448_s3 }
 0x21e   : > { %p1905_p9 = scmp.lt.u32.totalorder %s1903_s12, %s1899_s5  ;;  %p1907_p4 = scmp.lt.u32.totalorder %s1899_s5, %s2330_s13 }
 0x21f   : > { %p1901_p1 = pnand %p1900_p12, %p2203_p8 }
 0x220   : > { %p1906_p0 = por %p1905_p9, %p1904_p5 }
 0x221   : > { %p1902_p2 = pneg %p1901_p1 }
 0x222   : > { %p1908_p10 = por %p1907_p4, %p1906_p0 }
 0x224   : > { %p1909_p6 = pnand %p1908_p10, %p1902_p2 }
 0x226   : > { %1912 = shalt.err (!%p1909_p6)
}
 0x227   : > { %s2027_s25 = smov 128   ;;  %s2028_s27 = smov 8  }
 0x228   : > { %1581 = dma.vmem_to_hbm [thread:$0]  (%p2203_p8), %s2332_s30, 2048, %s2330_s13, %s1211_s14, %s2027_s25, %s2027_s25, %s2028_s27  }
 0x229   : > { %s2362_s6 = scalar_lea.vmem [#allocation9], %s2270_s2  ;;  %s2483_s13 = sld [smem:[#allocation20_spill]] }
 0x22a   : > { %s1251_s2 = sshll.u32 %s2362_s6, 4  ;;  %s1216_s18 = scalar_lea.sflag [#allocation10], %s2267_s7  ;;  %s2387_s2 = int_to_ptr.vmem [resolvable:$true] %s1251_s2 }
 0x22b   : > { %s1913_s19 = scalar_lea.vmem %s2387_s2, 2048  ;;  %s2029_s23 = smov [#allocation9]  }
 0x22c   : > { %p1914_p11 = scmp.ne.s32.totalorder %s2387_s2, %s1913_s19  ;;  %s1917_s24 = sshll.u32 %s2029_s23, 4  ;;  %s1918_s24 = int_to_ptr.vmem [resolvable:$false] %s1917_s24 }
 0x22d   : > { %s1919_s29 = scalar_lea.vmem %s1918_s24, 4096  ;;  %p1920_p7 = scmp.lt.s32.totalorder %s2387_s2, %s1918_s24 }
 0x22e   : > { %p1915_p13 = pnand %p1914_p11, %p2203_p8  ;;  %p1921_p12 = scmp.lt.s32.totalorder %s1919_s29, %s1913_s19 }
 0x22f   : > { %s2385_s14 = scalar_lea.hbm %s2483_s13, %s1529_s26 }
 0x230   : > { %p1916_p3 = pneg %p1915_p13  ;;  %p1922_p1 = por %p1921_p12, %p1920_p7 }
 0x232   : > { %p1923_p2 = pnand %p1922_p1, %p1916_p3 }
 0x2b5   : > { %v923_v16 = vpop.f32.mrb[0].mxu1 }
 0x2b6   : > { %v925_v17 = vpop.f32.mrb[1].mxu1 }
 0x2b7   : > { %v1553_v18 = vpack.c.bf16 %v925_v17, %v923_v16  ;;  %v927_v19 = vpop.f32.mrb[2].mxu1 }
 0x2b8   : > { %v929_v20 = vpop.f32.mrb[3].mxu1 }
 0x2b9   : > { %1194 = vst [vmem:[%s2362_s6] sm:$0xff] %v1553_v18  ;;  %v1554_v21 = vpack.c.bf16 %v929_v20, %v927_v19 }
 0x2bb   : > { %1195 = vst [vmem:[%s2362_s6 + $0x8] sm:$0xff] %v1554_v21 }
 0x2bd   : > { %v933_v22 = vpop.f32.mrb[4].mxu1 }
 0x2be   : > { %v935_v23 = vpop.f32.mrb[5].mxu1 }
 0x2bf   : > { %v1555_v24 = vpack.c.bf16 %v935_v23, %v933_v22  ;;  %v937_v25 = vpop.f32.mrb[6].mxu1 }
 0x2c0   : > { %v939_v26 = vpop.f32.mrb[7].mxu1 }
 0x2c1   : > { %1196 = vst [vmem:[%s2362_s6 + $0x10] sm:$0xff] %v1555_v24  ;;  %v1556_v27 = vpack.c.bf16 %v939_v26, %v937_v25 }
 0x2c3   : > { %1197 = vst [vmem:[%s2362_s6 + $0x18] sm:$0xff] %v1556_v27 }
 0x2c5   : > { %v943_v28 = vpop.f32.mrb[8].mxu1 }
 0x2c6   : > { %v945_v29 = vpop.f32.mrb[9].mxu1 }
 0x2c7   : > { %v1557_v30 = vpack.c.bf16 %v945_v29, %v943_v28  ;;  %v947_v31 = vpop.f32.mrb[10].mxu1 }
 0x2c8   : > { %v949_v32 = vpop.f32.mrb[11].mxu1 }
 0x2c9   : > { %1198 = vst [vmem:[%s2362_s6 + $0x20] sm:$0xff] %v1557_v30  ;;  %v1558_v33 = vpack.c.bf16 %v949_v32, %v947_v31 }
 0x2cb   : > { %1199 = vst [vmem:[%s2362_s6 + $0x28] sm:$0xff] %v1558_v33 }
 0x2cd   : > { %v953_v34 = vpop.f32.mrb[12].mxu1 }
 0x2ce   : > { %v955_v35 = vpop.f32.mrb[13].mxu1 }
 0x2cf   : > { %v1559_v36 = vpack.c.bf16 %v955_v35, %v953_v34  ;;  %v957_v37 = vpop.f32.mrb[14].mxu1 }
 0x2d0   : > { %v959_v38 = vpop.f32.mrb[15].mxu1 }
 0x2d1   : > { %1200 = vst [vmem:[%s2362_s6 + $0x30] sm:$0xff] %v1559_v36  ;;  %v1560_v39 = vpack.c.bf16 %v959_v38, %v957_v37 }
 0x2d3   : > { %1201 = vst [vmem:[%s2362_s6 + $0x38] sm:$0xff] %v1560_v39 }
 0x2d5   : > { %v963_v40 = vpop.f32.mrb[16].mxu1 }
 0x2d6   : > { %v965_v41 = vpop.f32.mrb[17].mxu1 }
 0x2d7   : > { %v1561_v42 = vpack.c.bf16 %v965_v41, %v963_v40  ;;  %v967_v43 = vpop.f32.mrb[18].mxu1 }
 0x2d8   : > { %v969_v44 = vpop.f32.mrb[19].mxu1 }
 0x2d9   : > { %1202 = vst [vmem:[%s2362_s6 + $0x40] sm:$0xff] %v1561_v42  ;;  %v1562_v45 = vpack.c.bf16 %v969_v44, %v967_v43 }
 0x2db   : > { %1203 = vst [vmem:[%s2362_s6 + $0x48] sm:$0xff] %v1562_v45 }
 0x2dd   : > { %v973_v46 = vpop.f32.mrb[20].mxu1 }
 0x2de   : > { %v975_v47 = vpop.f32.mrb[21].mxu1 }
 0x2df   : > { %v1563_v48 = vpack.c.bf16 %v975_v47, %v973_v46  ;;  %v977_v49 = vpop.f32.mrb[22].mxu1 }
 0x2e0   : > { %v979_v50 = vpop.f32.mrb[23].mxu1 }
 0x2e1   : > { %1204 = vst [vmem:[%s2362_s6 + $0x50] sm:$0xff] %v1563_v48  ;;  %v1564_v51 = vpack.c.bf16 %v979_v50, %v977_v49 }
 0x2e3   : > { %1205 = vst [vmem:[%s2362_s6 + $0x58] sm:$0xff] %v1564_v51 }
 0x2e5   : > { %v983_v52 = vpop.f32.mrb[24].mxu1 }
 0x2e6   : > { %v985_v53 = vpop.f32.mrb[25].mxu1 }
 0x2e7   : > { %v1565_v54 = vpack.c.bf16 %v985_v53, %v983_v52  ;;  %v987_v55 = vpop.f32.mrb[26].mxu1 }
 0x2e8   : > { %v989_v56 = vpop.f32.mrb[27].mxu1 }
 0x2e9   : > { %1206 = vst [vmem:[%s2362_s6 + $0x60] sm:$0xff] %v1565_v54  ;;  %v1566_v57 = vpack.c.bf16 %v989_v56, %v987_v55 }
 0x2eb   : > { %1207 = vst [vmem:[%s2362_s6 + $0x68] sm:$0xff] %v1566_v57 }
 0x2ed   : > { %v993_v58 = vpop.f32.mrb[28].mxu1 }
 0x2ee   : > { %v995_v59 = vpop.f32.mrb[29].mxu1 }
 0x2ef   : > { %v1567_v60 = vpack.c.bf16 %v995_v59, %v993_v58  ;;  %v997_v61 = vpop.f32.mrb[30].mxu1 }
 0x2f0   : > { %v999_v62 = vpop.f32.mrb[31].mxu1 }
 0x2f1   : > { %1208 = vst [vmem:[%s2362_s6 + $0x70] sm:$0xff] %v1567_v60  ;;  %v1568_v63 = vpack.c.bf16 %v999_v62, %v997_v61 }
 0x2f3   : > { %1209 = vst [vmem:[%s2362_s6 + $0x78] sm:$0xff] %v1568_v63 }
 0x2f4   : > { %1926 = shalt.err (!%p1923_p2)
}
 0x2f5   : > { %s1927_s26 = scalar_lea.hbm %s2385_s14, 2048  ;;  %s1931_s9 = scalar_lea.hbm %s2483_s13, 8192 }
 0x2f6   : > { %p1928_p5 = scmp.ne.s32.totalorder %s2385_s14, %s1927_s26  ;;  %p1932_p4 = scmp.lt.u32.totalorder %s2385_s14, %s2483_s13 }
 0x2f7   : > { %p1933_p10 = scmp.lt.u32.totalorder %s1931_s9, %s1927_s26  ;;  %p1935_p11 = scmp.lt.u32.totalorder %s1927_s26, %s2385_s14 }
 0x2f8   : > { %p1929_p9 = pnand %p1928_p5, %p2203_p8 }
 0x2f9   : > { %p1934_p6 = por %p1933_p10, %p1932_p4 }
 0x2fa   : > { %p1930_p0 = pneg %p1929_p9 }
 0x2fb   : > { %p1936_p13 = por %p1935_p11, %p1934_p6 }
 0x2fd   : > { %p1937_p3 = pnand %p1936_p13, %p1930_p0 }
 0x2ff   : > { %1940 = shalt.err (!%p1937_p3)
}
 0x300   : > { %1582 = dma.vmem_to_hbm [thread:$0]  (%p2203_p8), %s2387_s2, 2048, %s2385_s14, %s1216_s18, %s2027_s25, %s2027_s25, %s2028_s27  }
 0x301 PF: > { %s2484_s4 = sld [smem:[#allocation15_spill]]  ;;  %s2485_s6 = sld [smem:[#allocation16_spill]] }
 0x302   : > { %p1608_p7 = scmp.ge.s32.totalorder %s2019_s22, 2 }
 0x307   : > { %s1266_s30 = sand.u32 1, %s2484_s4   ;;  %p2486_p12 = scmp.ne.s32.totalorder %s2485_s6, 0 }
 0x308   : > { %s1267_s11 = scalar_lea.sflag [#allocation4], %s1266_s30 }
 0x309   : > { %p1597_p1 = pnand %p1608_p7, %p2486_p12 }
 0x30b   : > { %1982 = dma.done.wait (!%p1597_p1), %s1267_s11, 2048  }
 0x30c   : > { %1984 = vsyncadd (!%p1597_p1), %s1267_s11, 4294965248  ;;  %s1276_s8 = scalar_lea.sflag [#allocation10], %s1266_s30 }
 0x30d   : > { %1986 = dma.done.wait (!%p1597_p1), %s1276_s8, 2048  }
 0x30e   : > { %1988 = vsyncadd (!%p1597_p1), %s1276_s8, 4294965248  ;;  %s25_s22 = sadd.s32 1, %s2019_s22   ;;  %s2487_s7 = sld [smem:[#allocation17_spill]] }
 0x30f   : > { %p22_p2 = scmp.ge.s32.totalorder %s25_s22, 6   ;;  %s2488_s15 = smov %s1995_s16 }
 0x310   : > { %s2489_s16 = smov %s1999_s17  ;;  %s2490_s17 = smov %s2216_s1 }
 0x311   : > { %s2491_s18 = smov %s2011_s20  ;;  %s2492_s19 = smov %s2015_s21 }
 0x312   : > { %s2494_s21 = smov %s2500_s10  ;;  %24 = sbr.rel (!%p22_p2) target bundleno = 14 (0xe), region = 102 }
 0x314   : > { %s2493_s20 = smov %s2487_s7 }
 0x319   :  { %1281 = vsyncpa [#allocation3], 1 }
 0x31a   :  { %1283 = vsyncpa [#allocation3 + $0x1], 1 }
 0x31b   :  { %1284 = vsyncpa [#allocation6], 1 }
 0x31c   :  { %1285 = vsyncpa [#allocation4], 1 }
 0x31d   :  { %1287 = vsyncpa [#allocation4 + $0x1], 1 }
 0x31e   :  { %1288 = vsyncpa [#allocation10], 1 }
 0x31f   :  { %1290 = vsyncpa [#allocation10 + $0x1], 1 }

</bundles_post_ra>
